<compile_context>
chip_gen: v6e
topology: v6e:2x2x1
jax: 0.10.0
libtpu: 0.0.40
codegen_flags: <defaults>
</compile_context>

<pallas_src>
import functools

import jax
import jax.numpy as jnp
from jax.experimental import pallas as pl
from jax.experimental.pallas import tpu as pltpu


def _unmasked_head_kernel(x_ref, wq_ref, bq_ref, wkv_ref, bkv_ref,
                          o_ref, kv_cache, *, head_size, hp, tq):
    i = pl.program_id(1)  # query-tile index within the current batch

    # Fused K/V projection for the full sequence, computed ONCE per batch
    # (query axis is "arbitrary", so all query tiles of a batch run before the
    # batch block changes) and cached in bf16 for the MXU.
    @pl.when(i == 0)
    def _():
        kv = jnp.dot(x_ref[...], wkv_ref[...],
                     preferred_element_type=jnp.float32) + bkv_ref[...]
        kv_cache[...] = kv.astype(jnp.bfloat16)

    # Lane-tile-aligned (hp is a multiple of 128) bf16 views of the cache.
    k = kv_cache[:, :hp]                                        # (T, hp)
    v = kv_cache[:, hp:]                                        # (T, hp)

    # Q projection for this query tile, sliced from the resident full-sequence
    # x block (no second HBM stream of x).  Bias in f32; the 1/sqrt(head_size)
    # score scale is folded into q (tq*hp mults instead of tq*T).
    x_q = x_ref[pl.ds(pl.multiple_of(i * tq, tq), tq), :]       # (tq, C) bf16
    q = jnp.dot(x_q, wq_ref[...],
                preferred_element_type=jnp.float32) + bq_ref[...]
    q = (q * jnp.float32(head_size ** -0.5)).astype(jnp.bfloat16)

    # Scores: contract the head dim of q and k directly on the MXU
    # (no explicit K transpose through the XLU).
    s = jax.lax.dot_general(
        q, k, dimension_numbers=(((1,), (1,)), ((), ())),
        preferred_element_type=jnp.float32)                     # (tq, T) f32

    # Numerically stable softmax; elementwise math stays f32 (v5e has no bf16
    # VPU/EUP).  EUP approx reciprocal for the denominator.
    s = s - jnp.max(s, axis=-1, keepdims=True)
    p = jnp.exp(s)
    p = p * pl.reciprocal(jnp.sum(p, axis=-1, keepdims=True), approx=True)

    # Dropout on attention weights: identity in eval mode.

    # Output (tq, hp): lane-dense full-width bf16 stores (half the writeback
    # bytes of the previous f32 path).
    o_ref[...] = jnp.dot(p.astype(jnp.bfloat16), v,
                         preferred_element_type=jnp.float32).astype(o_ref.dtype)


def prepare_unmasked_head_params(wk, bk, wq, bq, wv, bv):
    """One-time weight preprocessing, hoisted out of the per-call path.

    Pads the head dim up to a lane-dense multiple of 128 with zeros (exact:
    zero columns of wq/wk contribute nothing to q.k and zero columns of wv
    give zero output columns that are sliced away), fuses [wk | wv] into one
    (C, 2*hp) matrix, and casts the MXU operands to bf16.  Biases stay f32.
    """
    C, H = wq.shape
    hp = ((H + 127) // 128) * 128

    def pad_w(w):
        return jnp.pad(w, ((0, 0), (0, hp - H)))

    def pad_b(b):
        return jnp.pad(jnp.reshape(b, (1, H)), ((0, 0), (0, hp - H)))

    return dict(
        wq=pad_w(wq).astype(jnp.bfloat16),
        bq=pad_b(bq).astype(jnp.float32),
        wkv=jnp.concatenate([pad_w(wk), pad_w(wv)], axis=1).astype(jnp.bfloat16),
        bkv=jnp.concatenate([pad_b(bk), pad_b(bv)], axis=1).astype(jnp.float32),
        head_size=H,
        hp=hp,
    )


def unmasked_head_apply(x, params, *, tq=256, single_buffer_weights=False):
    """x: (B, T, C) f32; params from prepare_unmasked_head_params -> (B, T, H) f32."""
    B, T, C = x.shape
    H, hp = params["head_size"], params["hp"]
    wq_p, bq_p = params["wq"], params["bq"]
    wkv_p, bkv_p = params["wkv"], params["bkv"]

    # Query-tile size must evenly divide T and be sublane-aligned; otherwise
    # fall back to a single full-sequence tile.
    tq = min(tq, T)
    if T % tq != 0 or tq % 8 != 0:
        tq = T
    n_q = T // tq

    x_bf16 = x.astype(jnp.bfloat16)

    # Bytes/flops consistent with the actual pattern: x full-sequence block is
    # DMA'd once per batch (its block index only changes with b), weights are
    # DMA'd once (constant index), KV projection runs once per batch, output
    # writeback is bf16.
    cost = pl.CostEstimate(
        flops=(2 * B * T * C * (2 * hp)      # fused K/V projection, once per batch
               + 2 * B * T * C * hp          # Q projection over all tiles
               + 4 * B * T * T * hp),        # QK^T + PV
        transcendentals=B * T * T,
        bytes_accessed=(B * T * C * 2
                        + (wq_p.size + wkv_p.size) * 2
                        + (bq_p.size + bkv_p.size) * 4
                        + B * T * hp * 2),
    )

    # Grid-invariant weight operands: optionally single-buffer them (their
    # block index never changes, so double-buffering buys nothing).
    weight_mode = (dict(pipeline_mode=pl.Buffered(1))
                   if single_buffer_weights else {})

    out_padded = pl.pallas_call(
        functools.partial(_unmasked_head_kernel, head_size=H, hp=hp, tq=tq),
        out_shape=jax.ShapeDtypeStruct((B, T, hp), jnp.bfloat16),
        grid_spec=pltpu.PrefetchScalarGridSpec(
            num_scalar_prefetch=0,
            grid=(B, n_q),
            in_specs=[
                # Full-sequence x block: the only x stream (query tiles are
                # sliced from it in-kernel).
                pl.BlockSpec((pl.Squeezed(), T, C), lambda b, i: (b, 0, 0)),
                pl.BlockSpec((C, hp), lambda b, i: (0, 0), **weight_mode),      # wq
                pl.BlockSpec((1, hp), lambda b, i: (0, 0), **weight_mode),      # bq
                pl.BlockSpec((C, 2 * hp), lambda b, i: (0, 0), **weight_mode),  # [wk|wv]
                pl.BlockSpec((1, 2 * hp), lambda b, i: (0, 0), **weight_mode),  # [bk|bv]
            ],
            out_specs=pl.BlockSpec((pl.Squeezed(), tq, hp),
                                   lambda b, i: (b, i, 0)),
            scratch_shapes=[pltpu.VMEM((T, 2 * hp), jnp.bfloat16)],  # cached K/V
        ),
        compiler_params=pltpu.CompilerParams(
            # Batch axis parallel (megacore-friendly when B >= 2); query axis
            # must be arbitrary so the cached K/V scratch is valid across it.
            dimension_semantics=("parallel", "arbitrary"),
            # Above the 16/32 MiB scoped defaults, below v7x's 64 MiB physical.
            vmem_limit_bytes=48 * 1024 * 1024,
        ),
        cost_estimate=cost,
    )(x_bf16, wq_p, bq_p, wkv_p, bkv_p)

    # Slice the zero-padded head dim back to H; restore the module's f32 output.
    return out_padded[..., :H].astype(jnp.float32)


def unmasked_head(x, wk, bk, wq, bq, wv, bv, *, tq=256):
    """Convenience wrapper (prefer preparing params once and reusing them)."""
    return unmasked_head_apply(x, prepare_unmasked_head_params(wk, bk, wq, bq, wv, bv),
                               tq=tq)


def reference(x, wk, bk, wq, bq, wv, bv):
    k = x @ wk + bk
    q = x @ wq + bq
    v = x @ wv + bv
    w = (q @ jnp.swapaxes(k, -2, -1)) * (wk.shape[1] ** -0.5)
    w = jax.nn.softmax(w, axis=-1)
    return w @ v


if __name__ == "__main__":
    # d_model = 256 per the module; H = 64 exercises the lane-padding path,
    # T = 256 with tq = 128 exercises query tiling AND the cached-KV reuse
    # (n_q = 2 tiles per batch).
    B, T, C, H = 2, 256, 256, 64

    key = jax.random.PRNGKey(0)
    kx, k1, k2, k3, k4, k5, k6 = jax.random.split(key, 7)

    x = jax.random.normal(kx, (B, T, C), dtype=jnp.float32)

    # Parameters for nn.Linear(d_model, head_size, bias=True), stored as
    # (C, H) / (1, H) so the kernel computes x @ W + b.
    scale = 1.0 / jnp.sqrt(jnp.float32(C))
    wk = jax.random.uniform(k1, (C, H), jnp.float32, -scale, scale)
    bk = jax.random.uniform(k2, (1, H), jnp.float32, -scale, scale)
    wq = jax.random.uniform(k3, (C, H), jnp.float32, -scale, scale)
    bq = jax.random.uniform(k4, (1, H), jnp.float32, -scale, scale)
    wv = jax.random.uniform(k5, (C, H), jnp.float32, -scale, scale)
    bv = jax.random.uniform(k6, (1, H), jnp.float32, -scale, scale)

    # Hoisted one-time weight preprocessing (pad / fuse / bf16 cast).
    params = prepare_unmasked_head_params(wk, bk, wq, bq, wv, bv)

    out = unmasked_head_apply(x, params, tq=128)
    out = jax.block_until_ready(out)

    ref = reference(x, wk, bk, wq, bq, wv, bv)
    assert out.shape == (B, T, H)
    # Tolerance relaxed for bf16 MXU inputs / bf16 writeback + approx
    # reciprocal (softmax itself stays f32).
    assert jnp.allclose(out, ref, atol=2e-2, rtol=2e-2), "mismatch vs reference"

    print("KERNEL_OK")
</pallas_src>

<mosaic_0001>
module attributes {stable_mosaic.version = 11 : i64} {
  func.func @_unmasked_head_kernel(%arg0: i32, %arg1: i32, %arg2: memref<1x256x256xbf16, #tpu.memory_space<vmem>>, %arg3: memref<256x128xbf16, #tpu.memory_space<vmem>>, %arg4: memref<1x128xf32, #tpu.memory_space<vmem>>, %arg5: memref<256x256xbf16, #tpu.memory_space<vmem>>, %arg6: memref<1x256xf32, #tpu.memory_space<vmem>>, %arg7: memref<1x128x128xbf16, #tpu.memory_space<vmem>>, %arg8: memref<256x256xbf16, #tpu.memory_space<vmem>>) attributes {dimension_semantics = [#tpu.dimension_semantics<parallel>, #tpu.dimension_semantics<arbitrary>], iteration_bounds = array<i64: 2, 2>, scalar_prefetch = 0 : i64, scratch_operands = 1 : i64, tpu.core_type = #tpu.core_type<tc>, window_params = [{transform_indices = @transform_0, window_bounds = array<i64: 1, 256, 256>}, {pipeline_mode = #tpu.pipeline_mode<synchronous>, transform_indices = @transform_1, window_bounds = array<i64: 256, 128>}, {pipeline_mode = #tpu.pipeline_mode<synchronous>, transform_indices = @transform_2, window_bounds = array<i64: 1, 128>}, {pipeline_mode = #tpu.pipeline_mode<synchronous>, transform_indices = @transform_3, window_bounds = array<i64: 256, 256>}, {pipeline_mode = #tpu.pipeline_mode<synchronous>, transform_indices = @transform_4, window_bounds = array<i64: 1, 256>}, {transform_indices = @transform_5, window_bounds = array<i64: 1, 128, 128>}]} {
    %c0_i32 = arith.constant 0 : i32
    %0 = arith.cmpi eq, %arg1, %c0_i32 : i32
    %1 = arith.extui %0 : i1 to i32
    %c0_i32_0 = arith.constant 0 : i32
    %2 = arith.cmpi ne, %1, %c0_i32_0 : i32
    scf.if %2 {
      %c0_17 = arith.constant 0 : index
      %c0_18 = arith.constant 0 : index
      %c0_19 = arith.constant 0 : index
      %35 = vector.load %arg2[%c0_17, %c0_18, %c0_19] : memref<1x256x256xbf16, #tpu.memory_space<vmem>>, vector<1x256x256xbf16>
      %36 = vector.shape_cast %35 : vector<1x256x256xbf16> to vector<256x256xbf16>
      %c0_20 = arith.constant 0 : index
      %c0_21 = arith.constant 0 : index
      %37 = vector.load %arg5[%c0_20, %c0_21] : memref<256x256xbf16, #tpu.memory_space<vmem>>, vector<256x256xbf16>
      %cst_22 = arith.constant dense<0.000000e+00> : vector<256x256xf32>
      %38 = tpu.matmul %36, %37, %cst_22 {dimension_numbers = #tpu.dot_dimension_numbers<[1], [0], [0], [1], [0, 0, 1, 1], [], []>} : vector<256x256xbf16>, vector<256x256xbf16>, vector<256x256xf32> -> vector<256x256xf32>
      %c0_23 = arith.constant 0 : index
      %c0_24 = arith.constant 0 : index
      %39 = vector.load %arg6[%c0_23, %c0_24] : memref<1x256xf32, #tpu.memory_space<vmem>>, vector<1x256xf32>
      %40 = vector.broadcast %39 : vector<1x256xf32> to vector<256x256xf32>
      %41 = arith.addf %38, %40 : vector<256x256xf32>
      %42 = arith.truncf %41 : vector<256x256xf32> to vector<256x256xbf16>
      %c0_25 = arith.constant 0 : index
      %c0_26 = arith.constant 0 : index
      %43 = vector.load %arg8[%c0_25, %c0_26] : memref<256x256xbf16, #tpu.memory_space<vmem>>, vector<256x256xbf16>
      tpu.vector_store %arg8[%c0_25, %c0_26], %42 {strides = array<i32>} : memref<256x256xbf16, #tpu.memory_space<vmem>>, vector<256x256xbf16>,
    } else {
    }
    %c0 = arith.constant 0 : index
    %c0_1 = arith.constant 0 : index
    %3 = vector.load %arg8[%c0, %c0_1] : memref<256x256xbf16, #tpu.memory_space<vmem>>, vector<256x128xbf16>
    %c0_2 = arith.constant 0 : index
    %c128 = arith.constant 128 : index
    %4 = vector.load %arg8[%c0_2, %c128] : memref<256x256xbf16, #tpu.memory_space<vmem>>, vector<256x128xbf16>
    %c128_i32 = arith.constant 128 : i32
    %5 = arith.muli %arg1, %c128_i32 : i32
    %6 = tpu.assume_multiple %5, 128 : i32
    %c0_3 = arith.constant 0 : index
    %7 = arith.index_cast %6 : i32 to index
    %c0_4 = arith.constant 0 : index
    %8 = vector.load %arg2[%c0_3, %7, %c0_4] : memref<1x256x256xbf16, #tpu.memory_space<vmem>>, vector<1x128x256xbf16>
    %9 = vector.shape_cast %8 : vector<1x128x256xbf16> to vector<128x256xbf16>
    %c0_5 = arith.constant 0 : index
    %c0_6 = arith.constant 0 : index
    %10 = vector.load %arg3[%c0_5, %c0_6] : memref<256x128xbf16, #tpu.memory_space<vmem>>, vector<256x128xbf16>
    %cst = arith.constant dense<0.000000e+00> : vector<128x128xf32>
    %11 = tpu.matmul %9, %10, %cst {dimension_numbers = #tpu.dot_dimension_numbers<[1], [0], [0], [1], [0, 0, 1, 1], [], []>} : vector<128x256xbf16>, vector<256x128xbf16>, vector<128x128xf32> -> vector<128x128xf32>
    %c0_7 = arith.constant 0 : index
    %c0_8 = arith.constant 0 : index
    %12 = vector.load %arg4[%c0_7, %c0_8] : memref<1x128xf32, #tpu.memory_space<vmem>>, vector<1x128xf32>
    %13 = vector.broadcast %12 : vector<1x128xf32> to vector<128x128xf32>
    %14 = arith.addf %11, %13 : vector<128x128xf32>
    %cst_9 = arith.constant 1.250000e-01 : f32
    %15 = vector.broadcast %cst_9 : f32 to vector<128x128xf32>
    %16 = arith.mulf %14, %15 : vector<128x128xf32>
    %17 = arith.truncf %16 : vector<128x128xf32> to vector<128x128xbf16>
    %cst_10 = arith.constant dense<0.000000e+00> : vector<128x256xf32>
    %18 = tpu.matmul %17, %3, %cst_10 {dimension_numbers = #tpu.dot_dimension_numbers<[1], [1], [0], [0], [0, 0, 1, 0], [], []>} : vector<128x128xbf16>, vector<256x128xbf16>, vector<128x256xf32> -> vector<128x256xf32>
    %cst_11 = arith.constant dense<0xFF800000> : vector<128xf32>
    %19 = vector.multi_reduction <maximumf>, %18, %cst_11 [1] : vector<128x256xf32> to vector<128xf32>
    %20 = vector.shape_cast %19 : vector<128xf32> to vector<128x1xf32>
    %21 = vector.broadcast %20 : vector<128x1xf32> to vector<128x256xf32>
    %22 = arith.subf %18, %21 : vector<128x256xf32>
    %23 = math.exp %22 : vector<128x256xf32>
    %cst_12 = arith.constant dense<0.000000e+00> : vector<128xf32>
    %24 = vector.multi_reduction <add>, %23, %cst_12 [1] : vector<128x256xf32> to vector<128xf32>
    %25 = vector.shape_cast %24 : vector<128xf32> to vector<128x1xf32>
    %26 = tpu.reciprocal %25 {approx = true} : vector<128x1xf32> -> vector<128x1xf32>
    %27 = vector.broadcast %26 : vector<128x1xf32> to vector<128x256xf32>
    %28 = arith.mulf %23, %27 : vector<128x256xf32>
    %29 = arith.truncf %28 : vector<128x256xf32> to vector<128x256xbf16>
    %cst_13 = arith.constant dense<0.000000e+00> : vector<128x128xf32>
    %30 = tpu.matmul %29, %4, %cst_13 {dimension_numbers = #tpu.dot_dimension_numbers<[1], [0], [0], [1], [0, 0, 1, 1], [], []>} : vector<128x256xbf16>, vector<256x128xbf16>, vector<128x128xf32> -> vector<128x128xf32>
    %31 = arith.truncf %30 : vector<128x128xf32> to vector<128x128xbf16>
    %c0_14 = arith.constant 0 : index
    %c0_15 = arith.constant 0 : index
    %c0_16 = arith.constant 0 : index
    %32 = vector.load %arg7[%c0_14, %c0_15, %c0_16] : memref<1x128x128xbf16, #tpu.memory_space<vmem>>, vector<1x128x128xbf16>
    %33 = vector.shape_cast %32 : vector<1x128x128xbf16> to vector<128x128xbf16>
    %34 = vector.shape_cast %31 : vector<128x128xbf16> to vector<1x128x128xbf16>
    tpu.vector_store %arg7[%c0_14, %c0_15, %c0_16], %34 {strides = array<i32>} : memref<1x128x128xbf16, #tpu.memory_space<vmem>>, vector<1x128x128xbf16>,
    return
  }
  func.func @transform_0(%arg0: i32, %arg1: i32) -> (i32, i32, i32) {
    %c0_i32 = arith.constant 0 : i32
    %c0_i32_0 = arith.constant 0 : i32
    %c0_i32_1 = arith.constant 0 : i32
    return %arg0, %c0_i32, %c0_i32_0 : i32, i32, i32
  }
  func.func @transform_1(%arg0: i32, %arg1: i32) -> (i32, i32) {
    %c0_i32 = arith.constant 0 : i32
    %c0_i32_0 = arith.constant 0 : i32
    %c0_i32_1 = arith.constant 0 : i32
    return %c0_i32, %c0_i32_0 : i32, i32
  }
  func.func @transform_2(%arg0: i32, %arg1: i32) -> (i32, i32) {
    %c0_i32 = arith.constant 0 : i32
    %c0_i32_0 = arith.constant 0 : i32
    %c0_i32_1 = arith.constant 0 : i32
    return %c0_i32, %c0_i32_0 : i32, i32
  }
  func.func @transform_3(%arg0: i32, %arg1: i32) -> (i32, i32) {
    %c0_i32 = arith.constant 0 : i32
    %c0_i32_0 = arith.constant 0 : i32
    %c0_i32_1 = arith.constant 0 : i32
    return %c0_i32, %c0_i32_0 : i32, i32
  }
  func.func @transform_4(%arg0: i32, %arg1: i32) -> (i32, i32) {
    %c0_i32 = arith.constant 0 : i32
    %c0_i32_0 = arith.constant 0 : i32
    %c0_i32_1 = arith.constant 0 : i32
    return %c0_i32, %c0_i32_0 : i32, i32
  }
  func.func @transform_5(%arg0: i32, %arg1: i32) -> (i32, i32, i32) {
    %c0_i32 = arith.constant 0 : i32
    %c0_i32_0 = arith.constant 0 : i32
    return %arg0, %arg1, %c0_i32 : i32, i32, i32
  }
}

</mosaic_0001>

<bundles_post_ra>
// kernel: tpu_custom_call.1
= control target key start
LH: loop header
LB: loop body
LE: loop exit
PB: predicated region body
PF: predicated region fallthrough
CT: control target
= control target key end

     0   :  { %s4195_s0 = inlined_call_operand.hbm [shape: bf16[2,256,256], index: 0, kind: input, shape index: {}]   ;;  %s4196_s1 = inlined_call_operand.hbm [shape: bf16[256,128], index: 1, kind: input, shape index: {}]   ;;  %s4197_s2 = inlined_call_operand.vmem [shape: f32[1,128], index: 2, kind: input, shape index: {}]   ;;  %s4198_s3 = inlined_call_operand.hbm [shape: bf16[256,256], index: 3, kind: input, shape index: {}]   ;;  %s4199_s4 = inlined_call_operand.vmem [shape: f32[1,256], index: 4, kind: input, shape index: {}]   ;;  %s4200_s5 = inlined_call_operand.hbm [shape: bf16[2,256,128], index: 5, kind: output, shape index: {}]  }
   0x1   :  { %4213 = sst [smem:[#allocation19_spill]] %s4196_s1 }
   0x2   :  { %4214 = sst [smem:[#allocation20_spill]] %s4198_s3 }
   0x3   :  { %4215 = sst [smem:[#allocation21_spill]] %s4200_s5 }
   0x4   :  { %10 = vsyncpa [#allocation4], 0 }
   0x5   :  { %12 = vsyncpa [#allocation4 + $0x1], 0 }
   0x6   :  { %13 = vsyncpa [#allocation7], 0 }
   0x7   :  { %14 = vsyncpa [#allocation5], 0 }
   0x8   :  { %16 = vsyncpa [#allocation5 + $0x1], 0  ;;  %s3534_s18 = smov 0   ;;  %s3536_s19 = smov 0  }
   0x9   :  { %s3538_s20 = smov 0   ;;  %s3540_s21 = smov 0  }
   0xa   :  { %s3542_s22 = smov 0   ;;  %s3544_s23 = smov 0  }
   0xb   :  { %s3546_s24 = smov 0   ;;  %s3548_s25 = smov 0  }
   0xc   :  { %s3550_s26 = smov 0   ;;  %s3552_s27 = smov 0  }
   0xd   :  { %s3554_s28 = smov 0  }
   0xe LB: > { %4216 = sst [smem:[#allocation13_spill]] %s3452_s18  ;;  %s2389_s29 = sadd.s32 4294967295, %s3492_s28   ;;  %s3492_s28 = sphi %s3554_s28, %s22_s28   ;;  %s3488_s27 = sphi %s3552_s27, %s4254_s27   ;;  %s3484_s26 = sphi %s3550_s26, %s4253_s26   ;;  %s3480_s25 = sphi %s3548_s25, %s4252_s25   ;;  %s3476_s24 = sphi %s3546_s24, %s4244_s24   ;;  %s3472_s23 = sphi %s3544_s23, %s4251_s23   ;;  %s3468_s22 = sphi %s3542_s22, %s4250_s22   ;;  %s3464_s21 = sphi %s3540_s21, %s4249_s21   ;;  %s3460_s20 = sphi %s3538_s20, %s4248_s20   ;;  %s3456_s19 = sphi %s3536_s19, %s4247_s19   ;;  %s3452_s18 = sphi %s3534_s18, %s4246_s18  }
   0xf   : > { %4217 = sst [smem:[#allocation14_spill]] %s3480_s25  ;;  %s2390_s30 = sadd.s32 4294967294, %s3492_s28  }
  0x10   : > { %4218 = sst [smem:[#allocation15_spill]] %s3484_s26  ;;  %p54_p0 = scmp.ne.s32.totalorder %s3468_s22, %s3464_s21 }
  0x11   : > { %p3590_p1 = scmp.eq.s32.totalorder %s2389_s29, 0  ;;  %p163_p2 = scmp.ne.s32.totalorder %s3460_s20, %s3456_s19 }
  0x12   : > { %p164_p4 = scmp.eq.s32.totalorder %s2389_s29, 3  ;;  %p169_p5 = scmp.ne.s32.totalorder %s3456_s19, %s3452_s18 }
  0x13   : > { %s4219_s6 = scalar_select %p3590_p1, 1, 0 }
  0x14   : > { %p3599_p3 = por %p3590_p1, %p54_p0  ;;  %p170_p6 = scmp.eq.s32.totalorder %s2390_s30, 3 }
  0x15   : > { %p3605_p7 = por %p164_p4, %p163_p2  ;;  %p2391_p8 = scmp.ge.s32.totalorder %s3492_s28, 1 }
  0x16   : > { %p3610_p9 = por %p170_p6, %p169_p5  ;;  %p177_p10 = scmp.lt.s32.totalorder %s3492_s28, 5 }
  0x17   : > { %s4221_s9 = scalar_select %p3605_p7, 1, 0 }
  0x18   : > { %s4223_s10 = scalar_select %p3610_p9, 1, 0 }
  0x19   : > { %4222 = sst [smem:[#allocation16_spill]] %s4221_s9  ;;  %p3615_p11 = pnand %p2391_p8, %p177_p10 }
  0x1a   : > { %4224 = sst [smem:[#allocation17_spill]] %s4223_s10  ;;  %s3494_s12 = smov [#allocation6]  }
  0x1b   : > { %s189_s13 = sshll.u32 %s3494_s12, 4  ;;  %p2907_p12 = pneg %p3615_p11  ;;  %s190_s13 = int_to_ptr.vmem [resolvable:$true] %s189_s13 }
  0x1c   : > { %s3495_s15 = smov [#allocation8]   ;;  %s3299_s17 = scalar_lea.vmem %s190_s13, 2048 }
  0x1d   : > { %p3623_p13 = pnand %p2907_p12, %p3590_p1  ;;  %s205_s16 = sshll.u32 %s3495_s15, 4  ;;  %s206_s16 = int_to_ptr.vmem [resolvable:$true] %s205_s16 }
  0x1e   : > { %p3300_p2 = scmp.ne.s32.totalorder %s190_s13, %s3299_s17  ;;  %p3307_p6 = scmp.lt.s32.totalorder %s190_s13, %s190_s13 }
  0x1f   : > { %p3290_p0 = pneg %p3623_p13  ;;  %p3308_p8 = scmp.lt.s32.totalorder %s3299_s17, %s3299_s17 }
  0x21   : > { %p3302_p4 = pnand %p3300_p2, %p3290_p0  ;;  %p3309_p10 = por %p3308_p8, %p3307_p6 }
  0x23   : > { %p3303_p5 = pneg %p3302_p4 }
  0x25   : > { %p3310_p12 = pnand %p3309_p10, %p3303_p5 }
  0x27   : > { %3313 = shalt.err (!%p3310_p12)
}
  0x28   : > { %s3496_s21 = smov 64   ;;  %s3497_s29 = smov 4  }
  0x29   : > { %s4227_s1 = sld [smem:[#allocation19_spill]]  ;;  %s3325_s15 = scalar_lea.vmem %s206_s16, 4096 }
  0x2a   : > { %p3326_p9 = scmp.ne.s32.totalorder %s206_s16, %s3325_s15  ;;  %p3333_p7 = scmp.lt.s32.totalorder %s206_s16, %s206_s16 }
  0x2b   : > { %p3334_p1 = scmp.lt.s32.totalorder %s3325_s15, %s3325_s15 }
  0x2c   : > { %p3328_p2 = pnand %p3326_p9, %p3290_p0 }
  0x2d   : > { %p3335_p6 = por %p3334_p1, %p3333_p7 }
  0x2e   : > { %p3329_p4 = pneg %p3328_p2 }
  0x2f   : > { %2910 = dma.hbm_to_vmem [thread:$0]  (!%p3623_p13), %s4227_s1, 2048, %s190_s13, [#allocation7], %s3496_s21, %s3496_s21, %s3497_s29  }
  0x30   : > { %p3336_p5 = pnand %p3335_p6, %p3329_p4 }
  0x32   : > { %3339 = shalt.err (!%p3336_p5)
}
  0x33   : > { %s4204_s17 = smov 128   ;;  %s4205_s13 = smov 8  }
  0x34   : > { %s4228_s3 = sld [smem:[#allocation20_spill]]  ;;  %s31_s30 = sadd.s32 1, %s3484_s26 }
  0x35   : > { %s34_s12 = sadd.s32 1, %s3488_s27  ;;  %p32_p1 = scmp.ge.s32.totalorder %s31_s30, 2 }
  0x36   : > { %s41_s15 = sadd.s32 1, %s3472_s23  ;;  %p48_p7 = scmp.ne.s32.totalorder %s3472_s23, %s3468_s22 }
  0x37   : > { %p49_p9 = scmp.eq.s32.totalorder %s3492_s28, 0  ;;  %s4256_s30 = smov (%p32_p1, %s31_s30), 0 }
  0x38   : > { %4229 = sst [smem:[#allocation18_spill]] %s4256_s30  ;;  %s4258_s12 = smov (!%p32_p1, %s34_s12), %s3488_s27 }
  0x39   : > { %p3657_p0 = por %p49_p9, %p48_p7  ;;  %s149_s21 = ssub.s32 %s3484_s26, %s4256_s30 }
  0x3a   : > { %2913 = dma.hbm_to_vmem [thread:$0]  (!%p3623_p13), %s4228_s3, 4096, %s206_s16, [#allocation7], %s4204_s17, %s4204_s17, %s4205_s13  }
  0x3b   : > { %p36_p13 = scmp.ge.s32.totalorder %s4258_s12, 2  ;;  %p2924_p8 = scmp.lt.s32.totalorder %s3492_s28, 4 }
  0x3c   : > { %s222_s16 = sand.u32 1, %s3472_s23   ;;  %s2590_s29 = sshll.u32 %s3488_s27, 12 }
  0x3d   : > { %s4260_s12 = smov (%p36_p13, %s4258_s12), 0  ;;  %s2395_s17 = sshll.u32 %s222_s16, 8 }
  0x3e   : > { %s38_s13 = ssub.s32 %s3488_s27, %s4260_s12  ;;  %s232_s10 = scalar_lea.hbm %s4195_s0, %s2590_s29 }
  0x3f   : > { %p39_p10 = scmp.eq.s32.totalorder %s38_s13, 0  ;;  %s150_s7 = sor.u32 %s149_s21, %s38_s13 }
  0x40   : > { %p151_p12 = scmp.eq.s32.totalorder %s150_s7, 0  ;;  %s4231_s30 = sadd.s32 1, %s3460_s20 }
  0x41   : > { %s3674_s18 = scalar_select %p39_p10, %s3472_s23, %s41_s15  }
  0x42   : > { %s3679_s26 = scalar_select %p151_p12, %s3460_s20, %s4231_s30  }
  0x43   : > { %s226_s5 = scalar_lea.vmem [#allocation3], %s2395_s17  ;;  %p3685_p2 = pnand %p2924_p8, %p3657_p0 }
  0x44   : > { %s233_s9 = sshll.u32 %s226_s5, 4  ;;  %s223_s7 = scalar_lea.sflag [#allocation4], %s222_s16  ;;  %s234_s9 = int_to_ptr.vmem [resolvable:$true] %s233_s9 }
  0x45   : > { %p3342_p4 = pneg %p3685_p2  ;;  %s3353_s1 = scalar_lea.vmem %s234_s9, 4096 }
  0x46   : > { %p3354_p6 = scmp.ne.s32.totalorder %s234_s9, %s3353_s1  ;;  %s3500_s3 = smov [#allocation3]  }
  0x47   : > { %s3358_s13 = sshll.u32 %s3500_s3, 4  ;;  %s3359_s13 = int_to_ptr.vmem [resolvable:$false] %s3358_s13 }
  0x48   : > { %p3356_p5 = pnand %p3354_p6, %p3342_p4  ;;  %s3360_s17 = scalar_lea.vmem %s3359_s13, 8192 }
  0x49   : > { %p3361_p7 = scmp.lt.s32.totalorder %s234_s9, %s3359_s13  ;;  %p3362_p9 = scmp.lt.s32.totalorder %s3360_s17, %s3353_s1 }
  0x4a   : > { %p3357_p1 = pneg %p3356_p5 }
  0x4b   : > { %p3363_p13 = por %p3362_p9, %p3361_p7 }
  0x4d   : > { %p3364_p0 = pnand %p3363_p13, %p3357_p1 }
  0x4f   : > { %3367 = shalt.err (!%p3364_p0)
}
  0x50   : > { %s4233_s5 = smov 8   ;;  %s4234_s30 = smov 128  }
  0x51   : > { %2917 = dma.hbm_to_vmem [thread:$0]  (!%p3685_p2), %s232_s10, 4096, %s234_s9, %s223_s7, %s4234_s30, %s4234_s30, %s4233_s5  }
  0x52   : > { %245 = sbr.rel (%p3615_p11) target bundleno = 1456 (0x5b0), region = 40  ;;  %s247_s15 = sand.u32 (!%p3615_p11), 1, %s3468_s22  }
  0x53   : > { %s2399_s14 = sshll.u32 (!%p3615_p11), %s247_s15, 8  ;;  %s248_s21 = scalar_lea.sflag (!%p3615_p11), [#allocation4], %s247_s15 }
  0x54   : > { %s3699_s16 = scalar_lea.vmem (!%p3615_p11), [#allocation3], %s2399_s14 }
  0x57   : > { %3439 = dma.done.wait (%p3599_p3), %s248_s21, 4096  }
  0x58   : > { %3441 = vsyncadd (%p3599_p3), %s248_s21, 4294963200  ;;  %p4235_p8 = scmp.ne.s32.totalorder %s4219_s6, 0 }
  0x5a   : > { %3443 = dma.done.wait (%p4235_p8), [#allocation7], 6144  }
  0x5b   : > { %3445 = vsyncadd (%p4235_p8), [#allocation7], 4294961152  ;;  %s283_s25 = sand.u32 1, %s3456_s19   ;;  %p2403_p11 = scmp.ne.s32.totalorder %s3476_s24, 0 }
  0x5c   : > { %s2402_s9 = sshll.u32 %s283_s25, 6 }
  0x5d   : > { %s3712_s10 = scalar_lea.vmem [#allocation9], %s2402_s9  ;;  %291 = sbr.rel (%p2403_p11) target bundleno = 423 (0x1a7), region = 56 }
  0x62   : > { %v3024_v0 = vld [vmem:[#allocation8 + $0x74] ss:$8 sps:$4 sm:$0xff]   ;;  %v3026_v1 = vld [vmem:[#allocation8 + $0x70] ss:$8 sps:$4 sm:$0xff]   ;;  %v3027_v2 = vld [vmem:[#allocation8 + $0x64] ss:$8 sps:$4 sm:$0xff]  }
  0x63   : > { %688 = vmatprep.subr.bf16.mxu0 %v3024_v0  ;;  %2847 = vmatprep.subr.bf16.mxu1 %v3024_v0  ;;  %v3029_v3 = vld [vmem:[#allocation8 + $0x60] ss:$8 sps:$4 sm:$0xff]   ;;  %v3030_v4 = vld [vmem:[#allocation8 + $0x54] ss:$8 sps:$4 sm:$0xff]   ;;  %v3032_v5 = vld [vmem:[#allocation8 + $0x50] ss:$8 sps:$4 sm:$0xff]   ;;  %v358_v0 = vlaneseq }
  0x64   : > { %689 = vmatpush1.bf16.msra.mxu0 %v3026_v1  ;;  %2863 = vmatpush1.bf16.msra.mxu1 %v3026_v1  ;;  %v3033_v6 = vld [vmem:[#allocation8 + $0x44] ss:$8 sps:$4 sm:$0xff]   ;;  %v3035_v7 = vld [vmem:[#allocation8 + $0x40] ss:$8 sps:$4 sm:$0xff]   ;;  %v3036_v8 = vld [vmem:[#allocation8 + $0x34] ss:$8 sps:$4 sm:$0xff]  }
  0x65   : > { %690 = vmatprep.subr.bf16.mxu0 %v3027_v2  ;;  %2848 = vmatprep.subr.bf16.mxu1 %v3027_v2  ;;  %v3038_v9 = vld [vmem:[#allocation8 + $0x30] ss:$8 sps:$4 sm:$0xff]   ;;  %v3039_v10 = vld [vmem:[#allocation8 + $0x24] ss:$8 sps:$4 sm:$0xff]   ;;  %v3041_v11 = vld [vmem:[#allocation8 + $0x20] ss:$8 sps:$4 sm:$0xff]  }
  0x66   : > { %v3042_v12 = vld [vmem:[#allocation8 + $0x14] ss:$8 sps:$4 sm:$0xff]   ;;  %v3074_v13 = vld [vmem:[%s3699_s16 + $0x4] ss:$8 sps:$4 sm:$0xff]   ;;  %v3044_v14 = vld [vmem:[#allocation8 + $0x10] ss:$8 sps:$4 sm:$0xff]  }
  0x67   : > { %v3077_v15 = vld [vmem:[%s3699_s16 + $0x84] ss:$8 sps:$4 sm:$0xff]   ;;  %720 = vmatprep.mubr.bf16.mxu0 %v3074_v13  ;;  %v3047_v17 = vld [vmem:[#allocation8] ss:$8 sps:$4 sm:$0xff]   ;;  %v3048_v18 = vld [vmem:[#allocation8 + $0xf4] ss:$8 sps:$4 sm:$0xff]  }
  0x68   : > { %691 = vmatpush1.bf16.msra.mxu0 %v3029_v3  ;;  %2864 = vmatpush1.bf16.msra.mxu1 %v3029_v3  ;;  %v3045_v16 = vld [vmem:[#allocation8 + $0x4] ss:$8 sps:$4 sm:$0xff]   ;;  %v3050_v19 = vld [vmem:[#allocation8 + $0xf0] ss:$8 sps:$4 sm:$0xff]   ;;  %v3053_v21 = vld [vmem:[#allocation8 + $0xe0] ss:$8 sps:$4 sm:$0xff]  }
  0x69   : > { %692 = vmatprep.subr.bf16.mxu0 %v3030_v4  ;;  %2849 = vmatprep.subr.bf16.mxu1 %v3030_v4  ;;  %v3051_v20 = vld [vmem:[#allocation8 + $0xe4] ss:$8 sps:$4 sm:$0xff]   ;;  %v3054_v22 = vld [vmem:[#allocation8 + $0xd4] ss:$8 sps:$4 sm:$0xff]   ;;  %v3056_v23 = vld [vmem:[#allocation8 + $0xd0] ss:$8 sps:$4 sm:$0xff]  }
  0x6a   : > { %800 = vmatprep.mubr.bf16.mxu1 %v3077_v15  ;;  %v3057_v24 = vld [vmem:[#allocation8 + $0xc4] ss:$8 sps:$4 sm:$0xff]   ;;  %v3059_v25 = vld [vmem:[#allocation8 + $0xc0] ss:$8 sps:$4 sm:$0xff]   ;;  %v3060_v26 = vld [vmem:[#allocation8 + $0xb4] ss:$8 sps:$4 sm:$0xff]  }
  0x6b   : > { %v3062_v27 = vld [vmem:[#allocation8 + $0xb0] ss:$8 sps:$4 sm:$0xff]   ;;  %v3063_v28 = vld [vmem:[#allocation8 + $0xa4] ss:$8 sps:$4 sm:$0xff]   ;;  %v3065_v29 = vld [vmem:[#allocation8 + $0xa0] ss:$8 sps:$4 sm:$0xff]  }
  0x6c   : > { %693 = vmatpush1.bf16.msra.mxu0 %v3032_v5  ;;  %2865 = vmatpush1.bf16.msra.mxu1 %v3032_v5  ;;  %v3066_v30 = vld [vmem:[#allocation8 + $0x94] ss:$8 sps:$4 sm:$0xff]   ;;  %v3068_v31 = vld [vmem:[#allocation8 + $0x90] ss:$8 sps:$4 sm:$0xff]   ;;  %v3069_v32 = vld [vmem:[#allocation8 + $0x84] ss:$8 sps:$4 sm:$0xff]  }
  0x6d   : > { %694 = vmatprep.subr.bf16.mxu0 %v3033_v6  ;;  %2850 = vmatprep.subr.bf16.mxu1 %v3033_v6  ;;  %v3071_v33 = vld [vmem:[#allocation8 + $0x80] ss:$8 sps:$4 sm:$0xff]   ;;  %v3078_v36 = vld [vmem:[%s3699_s16 + $0x14] ss:$8 sps:$4 sm:$0xff]   ;;  %v3082_v38 = vld [vmem:[%s3699_s16 + $0x10] ss:$8 sps:$4 sm:$0xff]  }
  0x6e   : > { %v3072_v34 = vld [vmem:[%s3699_s16] ss:$8 sps:$4 sm:$0xff]   ;;  %v3080_v37 = vld [vmem:[%s3699_s16 + $0x94] ss:$8 sps:$4 sm:$0xff]   ;;  %v3083_v39 = vld [vmem:[%s3699_s16 + $0x90] ss:$8 sps:$4 sm:$0xff]  }
  0x6f   : > { %v3075_v35 = vld [vmem:[%s3699_s16 + $0x80] ss:$8 sps:$4 sm:$0xff]   ;;  %v3084_v40 = vld [vmem:[%s3699_s16 + $0x24] ss:$8 sps:$4 sm:$0xff]   ;;  %v3090_v44 = vld [vmem:[%s3699_s16 + $0x34] ss:$8 sps:$4 sm:$0xff]  }
  0x70   : > { %695 = vmatpush1.bf16.msra.mxu0 %v3035_v7  ;;  %2866 = vmatpush1.bf16.msra.mxu1 %v3035_v7  ;;  %v3086_v41 = vld [vmem:[%s3699_s16 + $0xa4] ss:$8 sps:$4 sm:$0xff]   ;;  %v3088_v42 = vld [vmem:[%s3699_s16 + $0x20] ss:$8 sps:$4 sm:$0xff]   ;;  %v3092_v45 = vld [vmem:[%s3699_s16 + $0xb4] ss:$8 sps:$4 sm:$0xff]  }
  0x71   : > { %696 = vmatprep.subr.bf16.mxu0 %v3036_v8  ;;  %2851 = vmatprep.subr.bf16.mxu1 %v3036_v8  ;;  %v3089_v43 = vld [vmem:[%s3699_s16 + $0xa0] ss:$8 sps:$4 sm:$0xff]   ;;  %v3094_v46 = vld [vmem:[%s3699_s16 + $0x30] ss:$8 sps:$4 sm:$0xff]   ;;  %v3096_v48 = vld [vmem:[%s3699_s16 + $0x44] ss:$8 sps:$4 sm:$0xff]  }
  0x72   : > { %v3095_v47 = vld [vmem:[%s3699_s16 + $0xb0] ss:$8 sps:$4 sm:$0xff]   ;;  %v3098_v49 = vld [vmem:[%s3699_s16 + $0xc4] ss:$8 sps:$4 sm:$0xff]   ;;  %v3100_v50 = vld [vmem:[%s3699_s16 + $0x40] ss:$8 sps:$4 sm:$0xff]  }
  0x73   : > { %v3101_v51 = vld [vmem:[%s3699_s16 + $0xc0] ss:$8 sps:$4 sm:$0xff]   ;;  %v3102_v52 = vld [vmem:[%s3699_s16 + $0x54] ss:$8 sps:$4 sm:$0xff]   ;;  %v3106_v54 = vld [vmem:[%s3699_s16 + $0x50] ss:$8 sps:$4 sm:$0xff]  }
  0x74   : > { %697 = vmatpush1.bf16.msra.mxu0 %v3038_v9  ;;  %2867 = vmatpush1.bf16.msra.mxu1 %v3038_v9  ;;  %v3104_v53 = vld [vmem:[%s3699_s16 + $0xd4] ss:$8 sps:$4 sm:$0xff]   ;;  %v3107_v55 = vld [vmem:[%s3699_s16 + $0xd0] ss:$8 sps:$4 sm:$0xff]   ;;  %v3108_v56 = vld [vmem:[%s3699_s16 + $0x64] ss:$8 sps:$4 sm:$0xff]  }
  0x75   : > { %698 = vmatprep.subr.bf16.mxu0 %v3039_v10  ;;  %2852 = vmatprep.subr.bf16.mxu1 %v3039_v10  ;;  %v3110_v57 = vld [vmem:[%s3699_s16 + $0xe4] ss:$8 sps:$4 sm:$0xff]   ;;  %v3112_v58 = vld [vmem:[%s3699_s16 + $0x60] ss:$8 sps:$4 sm:$0xff]   ;;  %v3114_v60 = vld [vmem:[%s3699_s16 + $0x74] ss:$8 sps:$4 sm:$0xff]  }
  0x76   : > { %v3113_v59 = vld [vmem:[%s3699_s16 + $0xe0] ss:$8 sps:$4 sm:$0xff]   ;;  %v3116_v61 = vld [vmem:[%s3699_s16 + $0xf4] ss:$8 sps:$4 sm:$0xff]   ;;  %v3118_v62 = vld [vmem:[%s3699_s16 + $0x70] ss:$8 sps:$4 sm:$0xff]  }
  0x77   : > { %v3119_v63 = vld [vmem:[%s3699_s16 + $0xf0] ss:$8 sps:$4 sm:$0xff]   ;;  %v359_v1 = vshrl.u32 %v358_v0, 7  ;;  %v356_v4 = vld [vmem:[%s4199_s4] sm:$0x3] }
  0x78   : > { %699 = vmatpush1.bf16.msra.mxu0 %v3041_v11  ;;  %2868 = vmatpush1.bf16.msra.mxu1 %v3041_v11 }
  0x79   : > { %700 = vmatprep.subr.bf16.mxu0 %v3042_v12  ;;  %2853 = vmatprep.subr.bf16.mxu1 %v3042_v12  ;;  %v360_v2 = vsub.s32 0, %v359_v1  ;;  %v364_v3 = vsub.s32 1, %v359_v1 }
  0x7b   : > { %v3750_v5 = vrot.slane %v356_v4, %v360_v2  ;;  %v3752_v6 = vrot.slane %v356_v4, %v364_v3 }
  0x7c   : > { %701 = vmatpush1.bf16.msra.mxu0 %v3044_v14  ;;  %2869 = vmatpush1.bf16.msra.mxu1 %v3044_v14 }
  0x7d   : > { %702 = vmatprep.subr.bf16.mxu0 %v3045_v16  ;;  %2854 = vmatprep.subr.bf16.mxu1 %v3045_v16 }
  0x80   : > { %703 = vmatpush1.bf16.msra.mxu0 %v3047_v17  ;;  %2870 = vmatpush1.bf16.msra.mxu1 %v3047_v17 }
  0x81   : > { %704 = vmatprep.subr.bf16.mxu0 %v3048_v18  ;;  %2855 = vmatprep.subr.bf16.mxu1 %v3048_v18 }
  0x84   : > { %705 = vmatpush2.bf16.msra.mxu0 %v3050_v19  ;;  %2871 = vmatpush2.bf16.msra.mxu1 %v3050_v19 }
  0x85   : > { %706 = vmatprep.subr.bf16.mxu0 %v3051_v20  ;;  %2856 = vmatprep.subr.bf16.mxu1 %v3051_v20 }
  0x88   : > { %707 = vmatpush2.bf16.msra.mxu0 %v3053_v21  ;;  %2872 = vmatpush2.bf16.msra.mxu1 %v3053_v21 }
  0x89   : > { %708 = vmatprep.subr.bf16.mxu0 %v3054_v22  ;;  %2857 = vmatprep.subr.bf16.mxu1 %v3054_v22 }
  0x8c   : > { %709 = vmatpush2.bf16.msra.mxu0 %v3056_v23  ;;  %2873 = vmatpush2.bf16.msra.mxu1 %v3056_v23 }
  0x8d   : > { %710 = vmatprep.subr.bf16.mxu0 %v3057_v24  ;;  %2858 = vmatprep.subr.bf16.mxu1 %v3057_v24 }
  0x90   : > { %711 = vmatpush2.bf16.msra.mxu0 %v3059_v25  ;;  %2874 = vmatpush2.bf16.msra.mxu1 %v3059_v25 }
  0x91   : > { %712 = vmatprep.subr.bf16.mxu0 %v3060_v26  ;;  %2859 = vmatprep.subr.bf16.mxu1 %v3060_v26 }
  0x94   : > { %713 = vmatpush2.bf16.msra.mxu0 %v3062_v27  ;;  %2875 = vmatpush2.bf16.msra.mxu1 %v3062_v27 }
  0x95   : > { %714 = vmatprep.subr.bf16.mxu0 %v3063_v28  ;;  %2860 = vmatprep.subr.bf16.mxu1 %v3063_v28 }
  0x98   : > { %715 = vmatpush2.bf16.msra.mxu0 %v3065_v29  ;;  %2876 = vmatpush2.bf16.msra.mxu1 %v3065_v29 }
  0x99   : > { %716 = vmatprep.subr.bf16.mxu0 %v3066_v30  ;;  %2861 = vmatprep.subr.bf16.mxu1 %v3066_v30 }
  0x9c   : > { %717 = vmatpush2.bf16.msra.mxu0 %v3068_v31  ;;  %2877 = vmatpush2.bf16.msra.mxu1 %v3068_v31 }
  0x9d   : > { %718 = vmatprep.subr.bf16.mxu0 %v3069_v32  ;;  %2862 = vmatprep.subr.bf16.mxu1 %v3069_v32 }
  0xa0   : > { %719 = vmatpush2.bf16.msra.mxu0 %v3071_v33  ;;  %2878 = vmatpush2.bf16.msra.mxu1 %v3071_v33 }
  0xa3   : > { %721 = vmatmul.mubr.bf16.vlgmr.msra.gmra.mxu0 %v3072_v34  ;;  %801 = vmatmul.mubr.bf16.vlgmr.msra.gmra.mxu1 %v3075_v35 }
  0xa4   : > { %730 = vmatprep.mubr.bf16.mxu0 %v3078_v36  ;;  %810 = vmatprep.mubr.bf16.mxu1 %v3080_v37 }
  0xab   : > { %731 = vmatmul.mubr.bf16.gmra.mxu0 %v3082_v38  ;;  %811 = vmatmul.mubr.bf16.gmra.mxu1 %v3083_v39 }
  0xac   : > { %740 = vmatprep.mubr.bf16.mxu0 %v3084_v40  ;;  %820 = vmatprep.mubr.bf16.mxu1 %v3086_v41 }
  0xb3   : > { %741 = vmatmul.mubr.bf16.gmra.mxu0 %v3088_v42  ;;  %821 = vmatmul.mubr.bf16.gmra.mxu1 %v3089_v43 }
  0xb4   : > { %750 = vmatprep.mubr.bf16.mxu0 %v3090_v44  ;;  %830 = vmatprep.mubr.bf16.mxu1 %v3092_v45 }
  0xbb   : > { %751 = vmatmul.mubr.bf16.gmra.mxu0 %v3094_v46  ;;  %831 = vmatmul.mubr.bf16.gmra.mxu1 %v3095_v47 }
  0xbc   : > { %760 = vmatprep.mubr.bf16.mxu0 %v3096_v48  ;;  %840 = vmatprep.mubr.bf16.mxu1 %v3098_v49 }
  0xc3   : > { %761 = vmatmul.mubr.bf16.gmra.mxu0 %v3100_v50  ;;  %841 = vmatmul.mubr.bf16.gmra.mxu1 %v3101_v51 }
  0xc4   : > { %770 = vmatprep.mubr.bf16.mxu0 %v3102_v52  ;;  %850 = vmatprep.mubr.bf16.mxu1 %v3104_v53 }
  0xcb   : > { %771 = vmatmul.mubr.bf16.gmra.mxu0 %v3106_v54  ;;  %851 = vmatmul.mubr.bf16.gmra.mxu1 %v3107_v55 }
  0xcc   : > { %780 = vmatprep.mubr.bf16.mxu0 %v3108_v56  ;;  %860 = vmatprep.mubr.bf16.mxu1 %v3110_v57 }
  0xd3   : > { %781 = vmatmul.mubr.bf16.gmra.mxu0 %v3112_v58  ;;  %861 = vmatmul.mubr.bf16.gmra.mxu1 %v3113_v59 }
  0xd4   : > { %790 = vmatprep.mubr.bf16.mxu0 %v3114_v60  ;;  %870 = vmatprep.mubr.bf16.mxu1 %v3116_v61 }
  0xdb   : > { %791 = vmatmul.mubr.bf16.gmra.mxu0 %v3118_v62  ;;  %871 = vmatmul.mubr.bf16.gmra.mxu1 %v3119_v63 }
 0x163   : > { %v722_v7 = vpop.f32.mrf.mxu0  ;;  %v802_v8 = vpop.f32.mrf.mxu1 }
 0x164   : > { %v723_v11 = vadd.f32 %v722_v7, %v3750_v5  ;;  %v803_v12 = vadd.f32 %v802_v8, %v3750_v5 }
 0x165   : > { %v724_v9 = vpop.f32.mrf.mxu0  ;;  %v804_v10 = vpop.f32.mrf.mxu1 }
 0x166   : > { %v725_v13 = vadd.f32 %v724_v9, %v3752_v6  ;;  %v805_v14 = vadd.f32 %v804_v10, %v3752_v6 }
 0x167   : > { %v726_v15 = vpop.f32.mrf.mxu0  ;;  %v806_v16 = vpop.f32.mrf.mxu1 }
 0x168   : > { %v2591_v17 = vpack.c.bf16 %v725_v13, %v723_v11  ;;  %v2607_v18 = vpack.c.bf16 %v805_v14, %v803_v12  ;;  %v727_v21 = vadd.f32 %v726_v15, %v3750_v5  ;;  %v807_v22 = vadd.f32 %v806_v16, %v3750_v5 }
 0x169   : > { %v728_v19 = vpop.f32.mrf.mxu0  ;;  %v808_v20 = vpop.f32.mrf.mxu1 }
 0x16a   : > { %1073 = vst [vmem:[#allocation2] sm:$0xff] %v2591_v17  ;;  %1089 = vst [vmem:[#allocation2 + $0x80] sm:$0xff] %v2607_v18  ;;  %v729_v23 = vadd.f32 %v728_v19, %v3752_v6  ;;  %v809_v24 = vadd.f32 %v808_v20, %v3752_v6 }
 0x16b   : > { %v732_v25 = vpop.f32.mrf.mxu0  ;;  %v812_v26 = vpop.f32.mrf.mxu1 }
 0x16c   : > { %v2592_v27 = vpack.c.bf16 %v729_v23, %v727_v21  ;;  %v2608_v28 = vpack.c.bf16 %v809_v24, %v807_v22  ;;  %v733_v31 = vadd.f32 %v732_v25, %v3750_v5  ;;  %v813_v32 = vadd.f32 %v812_v26, %v3750_v5 }
 0x16d   : > { %v734_v29 = vpop.f32.mrf.mxu0  ;;  %v814_v30 = vpop.f32.mrf.mxu1 }
 0x16e   : > { %1074 = vst [vmem:[#allocation2 + $0x8] sm:$0xff] %v2592_v27  ;;  %1090 = vst [vmem:[#allocation2 + $0x88] sm:$0xff] %v2608_v28  ;;  %v735_v33 = vadd.f32 %v734_v29, %v3752_v6  ;;  %v815_v34 = vadd.f32 %v814_v30, %v3752_v6 }
 0x16f   : > { %v736_v35 = vpop.f32.mrf.mxu0  ;;  %v816_v36 = vpop.f32.mrf.mxu1 }
 0x170   : > { %v2593_v37 = vpack.c.bf16 %v735_v33, %v733_v31  ;;  %v2609_v38 = vpack.c.bf16 %v815_v34, %v813_v32  ;;  %v737_v41 = vadd.f32 %v736_v35, %v3750_v5  ;;  %v817_v42 = vadd.f32 %v816_v36, %v3750_v5 }
 0x171   : > { %v738_v39 = vpop.f32.mrf.mxu0  ;;  %v818_v40 = vpop.f32.mrf.mxu1 }
 0x172   : > { %1075 = vst [vmem:[#allocation2 + $0x10] sm:$0xff] %v2593_v37  ;;  %1091 = vst [vmem:[#allocation2 + $0x90] sm:$0xff] %v2609_v38  ;;  %v739_v43 = vadd.f32 %v738_v39, %v3752_v6  ;;  %v819_v44 = vadd.f32 %v818_v40, %v3752_v6 }
 0x173   : > { %v742_v45 = vpop.f32.mrf.mxu0  ;;  %v822_v46 = vpop.f32.mrf.mxu1 }
 0x174   : > { %v2594_v47 = vpack.c.bf16 %v739_v43, %v737_v41  ;;  %v2610_v48 = vpack.c.bf16 %v819_v44, %v817_v42  ;;  %v743_v51 = vadd.f32 %v742_v45, %v3750_v5  ;;  %v823_v52 = vadd.f32 %v822_v46, %v3750_v5 }
 0x175   : > { %v744_v49 = vpop.f32.mrf.mxu0  ;;  %v824_v50 = vpop.f32.mrf.mxu1 }
 0x176   : > { %1076 = vst [vmem:[#allocation2 + $0x18] sm:$0xff] %v2594_v47  ;;  %1092 = vst [vmem:[#allocation2 + $0x98] sm:$0xff] %v2610_v48  ;;  %v745_v53 = vadd.f32 %v744_v49, %v3752_v6  ;;  %v825_v54 = vadd.f32 %v824_v50, %v3752_v6 }
 0x177   : > { %v746_v55 = vpop.f32.mrf.mxu0  ;;  %v826_v56 = vpop.f32.mrf.mxu1 }
 0x178   : > { %v2595_v57 = vpack.c.bf16 %v745_v53, %v743_v51  ;;  %v2611_v58 = vpack.c.bf16 %v825_v54, %v823_v52  ;;  %v747_v61 = vadd.f32 %v746_v55, %v3750_v5  ;;  %v827_v62 = vadd.f32 %v826_v56, %v3750_v5 }
 0x179   : > { %v748_v59 = vpop.f32.mrf.mxu0  ;;  %v828_v60 = vpop.f32.mrf.mxu1 }
 0x17a   : > { %1077 = vst [vmem:[#allocation2 + $0x20] sm:$0xff] %v2595_v57  ;;  %1093 = vst [vmem:[#allocation2 + $0xa0] sm:$0xff] %v2611_v58  ;;  %v749_v63 = vadd.f32 %v748_v59, %v3752_v6  ;;  %v829_v0 = vadd.f32 %v828_v60, %v3752_v6 }
 0x17b   : > { %v752_v1 = vpop.f32.mrf.mxu0  ;;  %v832_v2 = vpop.f32.mrf.mxu1 }
 0x17c   : > { %v2596_v3 = vpack.c.bf16 %v749_v63, %v747_v61  ;;  %v2612_v4 = vpack.c.bf16 %v829_v0, %v827_v62  ;;  %v753_v9 = vadd.f32 %v752_v1, %v3750_v5  ;;  %v833_v10 = vadd.f32 %v832_v2, %v3750_v5 }
 0x17d   : > { %v754_v7 = vpop.f32.mrf.mxu0  ;;  %v834_v8 = vpop.f32.mrf.mxu1 }
 0x17e   : > { %1078 = vst [vmem:[#allocation2 + $0x28] sm:$0xff] %v2596_v3  ;;  %1094 = vst [vmem:[#allocation2 + $0xa8] sm:$0xff] %v2612_v4  ;;  %v755_v11 = vadd.f32 %v754_v7, %v3752_v6  ;;  %v835_v12 = vadd.f32 %v834_v8, %v3752_v6 }
 0x17f   : > { %v756_v13 = vpop.f32.mrf.mxu0  ;;  %v836_v14 = vpop.f32.mrf.mxu1 }
 0x180   : > { %v2597_v15 = vpack.c.bf16 %v755_v11, %v753_v9  ;;  %v2613_v16 = vpack.c.bf16 %v835_v12, %v833_v10  ;;  %v757_v19 = vadd.f32 %v756_v13, %v3750_v5  ;;  %v837_v20 = vadd.f32 %v836_v14, %v3750_v5 }
 0x181   : > { %v758_v17 = vpop.f32.mrf.mxu0  ;;  %v838_v18 = vpop.f32.mrf.mxu1 }
 0x182   : > { %1079 = vst [vmem:[#allocation2 + $0x30] sm:$0xff] %v2597_v15  ;;  %1095 = vst [vmem:[#allocation2 + $0xb0] sm:$0xff] %v2613_v16  ;;  %v759_v21 = vadd.f32 %v758_v17, %v3752_v6  ;;  %v839_v22 = vadd.f32 %v838_v18, %v3752_v6 }
 0x183   : > { %v762_v23 = vpop.f32.mrf.mxu0  ;;  %v842_v24 = vpop.f32.mrf.mxu1 }
 0x184   : > { %v2598_v25 = vpack.c.bf16 %v759_v21, %v757_v19  ;;  %v2614_v26 = vpack.c.bf16 %v839_v22, %v837_v20  ;;  %v763_v29 = vadd.f32 %v762_v23, %v3750_v5  ;;  %v843_v30 = vadd.f32 %v842_v24, %v3750_v5 }
 0x185   : > { %v764_v27 = vpop.f32.mrf.mxu0  ;;  %v844_v28 = vpop.f32.mrf.mxu1 }
 0x186   : > { %1080 = vst [vmem:[#allocation2 + $0x38] sm:$0xff] %v2598_v25  ;;  %1096 = vst [vmem:[#allocation2 + $0xb8] sm:$0xff] %v2614_v26  ;;  %v765_v31 = vadd.f32 %v764_v27, %v3752_v6  ;;  %v845_v32 = vadd.f32 %v844_v28, %v3752_v6 }
 0x187   : > { %v766_v33 = vpop.f32.mrf.mxu0  ;;  %v846_v34 = vpop.f32.mrf.mxu1 }
 0x188   : > { %v2599_v35 = vpack.c.bf16 %v765_v31, %v763_v29  ;;  %v2615_v36 = vpack.c.bf16 %v845_v32, %v843_v30  ;;  %v767_v39 = vadd.f32 %v766_v33, %v3750_v5  ;;  %v847_v40 = vadd.f32 %v846_v34, %v3750_v5 }
 0x189   : > { %v768_v37 = vpop.f32.mrf.mxu0  ;;  %v848_v38 = vpop.f32.mrf.mxu1 }
 0x18a   : > { %1081 = vst [vmem:[#allocation2 + $0x40] sm:$0xff] %v2599_v35  ;;  %1097 = vst [vmem:[#allocation2 + $0xc0] sm:$0xff] %v2615_v36  ;;  %v769_v41 = vadd.f32 %v768_v37, %v3752_v6  ;;  %v849_v42 = vadd.f32 %v848_v38, %v3752_v6 }
 0x18b   : > { %v772_v43 = vpop.f32.mrf.mxu0  ;;  %v852_v44 = vpop.f32.mrf.mxu1 }
 0x18c   : > { %v2600_v45 = vpack.c.bf16 %v769_v41, %v767_v39  ;;  %v2616_v46 = vpack.c.bf16 %v849_v42, %v847_v40  ;;  %v773_v49 = vadd.f32 %v772_v43, %v3750_v5  ;;  %v853_v50 = vadd.f32 %v852_v44, %v3750_v5 }
 0x18d   : > { %v774_v47 = vpop.f32.mrf.mxu0  ;;  %v854_v48 = vpop.f32.mrf.mxu1 }
 0x18e   : > { %1082 = vst [vmem:[#allocation2 + $0x48] sm:$0xff] %v2600_v45  ;;  %1098 = vst [vmem:[#allocation2 + $0xc8] sm:$0xff] %v2616_v46  ;;  %v775_v51 = vadd.f32 %v774_v47, %v3752_v6  ;;  %v855_v52 = vadd.f32 %v854_v48, %v3752_v6 }
 0x18f   : > { %v776_v53 = vpop.f32.mrf.mxu0  ;;  %v856_v54 = vpop.f32.mrf.mxu1 }
 0x190   : > { %v2601_v55 = vpack.c.bf16 %v775_v51, %v773_v49  ;;  %v2617_v56 = vpack.c.bf16 %v855_v52, %v853_v50  ;;  %v777_v59 = vadd.f32 %v776_v53, %v3750_v5  ;;  %v857_v60 = vadd.f32 %v856_v54, %v3750_v5 }
 0x191   : > { %v778_v57 = vpop.f32.mrf.mxu0  ;;  %v858_v58 = vpop.f32.mrf.mxu1 }
 0x192   : > { %1083 = vst [vmem:[#allocation2 + $0x50] sm:$0xff] %v2601_v55  ;;  %1099 = vst [vmem:[#allocation2 + $0xd0] sm:$0xff] %v2617_v56  ;;  %v779_v61 = vadd.f32 %v778_v57, %v3752_v6  ;;  %v859_v62 = vadd.f32 %v858_v58, %v3752_v6 }
 0x193   : > { %v782_v63 = vpop.f32.mrf.mxu0  ;;  %v862_v0 = vpop.f32.mrf.mxu1 }
 0x194   : > { %v2602_v1 = vpack.c.bf16 %v779_v61, %v777_v59  ;;  %v2618_v2 = vpack.c.bf16 %v859_v62, %v857_v60  ;;  %v783_v7 = vadd.f32 %v782_v63, %v3750_v5  ;;  %v863_v8 = vadd.f32 %v862_v0, %v3750_v5 }
 0x195   : > { %v784_v3 = vpop.f32.mrf.mxu0  ;;  %v864_v4 = vpop.f32.mrf.mxu1 }
 0x196   : > { %1084 = vst [vmem:[#allocation2 + $0x58] sm:$0xff] %v2602_v1  ;;  %1100 = vst [vmem:[#allocation2 + $0xd8] sm:$0xff] %v2618_v2  ;;  %v785_v9 = vadd.f32 %v784_v3, %v3752_v6  ;;  %v865_v10 = vadd.f32 %v864_v4, %v3752_v6 }
 0x197   : > { %v786_v11 = vpop.f32.mrf.mxu0  ;;  %v866_v12 = vpop.f32.mrf.mxu1 }
 0x198   : > { %v2603_v13 = vpack.c.bf16 %v785_v9, %v783_v7  ;;  %v2619_v14 = vpack.c.bf16 %v865_v10, %v863_v8  ;;  %v787_v17 = vadd.f32 %v786_v11, %v3750_v5  ;;  %v867_v18 = vadd.f32 %v866_v12, %v3750_v5 }
 0x199   : > { %v788_v15 = vpop.f32.mrf.mxu0  ;;  %v868_v16 = vpop.f32.mrf.mxu1 }
 0x19a   : > { %1085 = vst [vmem:[#allocation2 + $0x60] sm:$0xff] %v2603_v13  ;;  %1101 = vst [vmem:[#allocation2 + $0xe0] sm:$0xff] %v2619_v14  ;;  %v789_v19 = vadd.f32 %v788_v15, %v3752_v6  ;;  %v869_v20 = vadd.f32 %v868_v16, %v3752_v6 }
 0x19b   : > { %v792_v21 = vpop.f32.mrf.mxu0  ;;  %v872_v22 = vpop.f32.mrf.mxu1 }
 0x19c   : > { %v2604_v23 = vpack.c.bf16 %v789_v19, %v787_v17  ;;  %v2620_v24 = vpack.c.bf16 %v869_v20, %v867_v18  ;;  %v793_v27 = vadd.f32 %v792_v21, %v3750_v5  ;;  %v873_v28 = vadd.f32 %v872_v22, %v3750_v5 }
 0x19d   : > { %v794_v25 = vpop.f32.mrf.mxu0  ;;  %v874_v26 = vpop.f32.mrf.mxu1 }
 0x19e   : > { %1086 = vst [vmem:[#allocation2 + $0x68] sm:$0xff] %v2604_v23  ;;  %1102 = vst [vmem:[#allocation2 + $0xe8] sm:$0xff] %v2620_v24  ;;  %v795_v29 = vadd.f32 %v794_v25, %v3752_v6  ;;  %v875_v30 = vadd.f32 %v874_v26, %v3752_v6 }
 0x19f   : > { %v796_v31 = vpop.f32.mrf.mxu0  ;;  %v876_v32 = vpop.f32.mrf.mxu1 }
 0x1a0   : > { %v2605_v33 = vpack.c.bf16 %v795_v29, %v793_v27  ;;  %v2621_v34 = vpack.c.bf16 %v875_v30, %v873_v28  ;;  %v797_v37 = vadd.f32 %v796_v31, %v3750_v5  ;;  %v877_v38 = vadd.f32 %v876_v32, %v3750_v5 }
 0x1a1   : > { %v798_v35 = vpop.f32.mrf.mxu0  ;;  %v878_v36 = vpop.f32.mrf.mxu1 }
 0x1a2   : > { %1087 = vst [vmem:[#allocation2 + $0x70] sm:$0xff] %v2605_v33  ;;  %1103 = vst [vmem:[#allocation2 + $0xf0] sm:$0xff] %v2621_v34  ;;  %v799_v39 = vadd.f32 %v798_v35, %v3752_v6  ;;  %v879_v40 = vadd.f32 %v878_v36, %v3752_v6 }
 0x1a4   : > { %v2606_v41 = vpack.c.bf16 %v799_v39, %v797_v37  ;;  %v2622_v42 = vpack.c.bf16 %v879_v40, %v877_v38 }
 0x1a6   : > { %1088 = vst [vmem:[#allocation2 + $0x78] sm:$0xff] %v2606_v41  ;;  %1104 = vst [vmem:[#allocation2 + $0xf8] sm:$0xff] %v2622_v42 }
 0x1a7 PF: > { %v3120_v43 = vld [vmem:[#allocation6 + $0x78] sm:$0xff]   ;;  %v3122_v45 = vld [vmem:[#allocation6 + $0x70] sm:$0xff]   ;;  %v3124_v47 = vld [vmem:[#allocation6 + $0x68] sm:$0xff]   ;;  %s2500_s11 = sshll.u32 %s3476_s24, 7  ;;  %s4236_s3 = sld [smem:[#allocation14_spill]] }
 0x1a8   : > { %v3121_v44 = vld [vmem:[#allocation6 + $0x38] sm:$0xff]   ;;  %2687 = vmatprep.subr.bf16.mxu0 %v3120_v43  ;;  %v3123_v46 = vld [vmem:[#allocation6 + $0x30] sm:$0xff]   ;;  %v3125_v5 = vld [vmem:[#allocation6 + $0x28] sm:$0xff]   ;;  %s3820_s29 = scalar_lea.vmem %s3699_s16, %s2500_s11 [#allocation3]  ;;  %s2585_s13 = sshll.u32 %s3476_s24, 4 }
 0x1a9   : > { %2688 = vmatpush3.bf16.msra.mxu0 %v3121_v44  ;;  %v3126_v48 = vld [vmem:[#allocation6 + $0x60] sm:$0xff]   ;;  %v3128_v49 = vld [vmem:[#allocation6 + $0x58] sm:$0xff]   ;;  %v3130_v51 = vld [vmem:[#allocation6 + $0x50] sm:$0xff]   ;;  %s4237_s30 = sld [smem:[#allocation16_spill]]  ;;  %s2281_s14 = sshll.u32 %s3712_s10, 4  ;;  %s4130_s14 = int_to_ptr.vmem [resolvable:$true] %s2281_s14 }
 0x1aa   : > { %2689 = vmatprep.subr.bf16.mxu0 %v3122_v45  ;;  %v3127_v6 = vld [vmem:[#allocation6 + $0x20] sm:$0xff]   ;;  %v3129_v50 = vld [vmem:[#allocation6 + $0x18] sm:$0xff]   ;;  %v3131_v53 = vld [vmem:[#allocation6 + $0x10] sm:$0xff]   ;;  %s4238_s16 = sld [smem:[#allocation21_spill]]  ;;  %s4135_s6 = scalar_lea.sflag [#allocation5], %s283_s25 }
 0x1ab   : > { %v3138_v52 = vld [vmem:[%s3820_s29 + $0x4] ss:$8 sps:$4 sm:$0xff]   ;;  %v3162_v60 = vld [vmem:[#allocation2 + $0xe0] ss:$8 sps:$4 sm:$0xff]   ;;  %v3139_v62 = vld [vmem:[%s3820_s29 + $0x14] ss:$8 sps:$4 sm:$0xff]  }
 0x1ac   : > { %1438 = vmatprep.mubr.bf16.mxu0 %v3138_v52  ;;  %v3132_v54 = vld [vmem:[#allocation6 + $0x48] sm:$0xff]   ;;  %v3134_v56 = vld [vmem:[#allocation6 + $0x40] sm:$0xff]   ;;  %v3164_v0 = vld [vmem:[#allocation2 + $0xd0] ss:$8 sps:$4 sm:$0xff]   ;;  %s3368_s8 = scalar_lea.vmem %s4130_s14, 1024  ;;  %s3501_s11 = smov [#allocation9]  }
 0x1ad   : > { %2690 = vmatpush3.bf16.msra.mxu0 %v3123_v46  ;;  %v3133_v55 = vld [vmem:[#allocation6 + $0x8] sm:$0xff]   ;;  %v3135_v57 = vld [vmem:[#allocation6] sm:$0xff]   ;;  %v3160_v58 = vld [vmem:[#allocation2 + $0xf0] ss:$8 sps:$4 sm:$0xff]   ;;  %s2586_s17 = sshll.u32 %s4236_s3, 5  ;;  %p3369_p3 = scmp.ne.s32.totalorder %s4130_s14, %s3368_s8 }
 0x1ae   : > { %2691 = vmatprep.subr.bf16.mxu0 %v3124_v47  ;;  %v3161_v59 = vld [vmem:[#allocation2 + $0x70] ss:$8 sps:$4 sm:$0xff]   ;;  %2751 = vmatprep.subr.bf16.mxu1 %v3160_v58  ;;  %v3136_v61 = vld [vmem:[%s3820_s29] ss:$8 sps:$4 sm:$0xff]   ;;  %v3142_v2 = vld [vmem:[%s3820_s29 + $0x24] ss:$8 sps:$4 sm:$0xff]   ;;  %s2278_s5 = sadd.s32 %s2586_s17, %s2585_s13 }
 0x1af   : > { %2752 = vmatpush3.bf16.xpose.msra.mxu1 %v3161_v59  ;;  %v3163_v63 = vld [vmem:[#allocation2 + $0x60] ss:$8 sps:$4 sm:$0xff]   ;;  %v3141_v1 = vld [vmem:[%s3820_s29 + $0x10] ss:$8 sps:$4 sm:$0xff]   ;;  %v3145_v8 = vld [vmem:[%s3820_s29 + $0x34] ss:$8 sps:$4 sm:$0xff]  }
 0x1b0   : > { %2753 = vmatprep.subr.bf16.mxu1 %v3162_v60  ;;  %v3165_v3 = vld [vmem:[#allocation2 + $0x50] ss:$8 sps:$4 sm:$0xff]   ;;  %v3166_v4 = vld [vmem:[#allocation2 + $0xc0] ss:$8 sps:$4 sm:$0xff]   ;;  %v3148_v12 = vld [vmem:[%s3820_s29 + $0x44] ss:$8 sps:$4 sm:$0xff]  }
 0x1b1   : > { %2692 = vmatpush3.bf16.msra.mxu0 %v3125_v5  ;;  %v3144_v7 = vld [vmem:[%s3820_s29 + $0x20] ss:$8 sps:$4 sm:$0xff]   ;;  %v3168_v10 = vld [vmem:[#allocation2 + $0xb0] ss:$8 sps:$4 sm:$0xff]   ;;  %v3151_v16 = vld [vmem:[%s3820_s29 + $0x54] ss:$8 sps:$4 sm:$0xff]  }
 0x1b2   : > { %2693 = vmatprep.subr.bf16.mxu0 %v3126_v48  ;;  %v3167_v9 = vld [vmem:[#allocation2 + $0x40] ss:$8 sps:$4 sm:$0xff]   ;;  %v3147_v11 = vld [vmem:[%s3820_s29 + $0x30] ss:$8 sps:$4 sm:$0xff]   ;;  %v3154_v19 = vld [vmem:[%s3820_s29 + $0x64] ss:$8 sps:$4 sm:$0xff]  }
 0x1b3   : > { %v3169_v13 = vld [vmem:[#allocation2 + $0x30] ss:$8 sps:$4 sm:$0xff]   ;;  %v3170_v14 = vld [vmem:[#allocation2 + $0xa0] ss:$8 sps:$4 sm:$0xff]   ;;  %v3157_v21 = vld [vmem:[%s3820_s29 + $0x74] ss:$8 sps:$4 sm:$0xff]  }
 0x1b4   : > { %v3150_v15 = vld [vmem:[%s3820_s29 + $0x40] ss:$8 sps:$4 sm:$0xff]   ;;  %v3153_v18 = vld [vmem:[%s3820_s29 + $0x50] ss:$8 sps:$4 sm:$0xff]   ;;  %s2587_s15 = sshll.u32 %s2278_s5, 6  ;;  %p4239_p10 = scmp.ne.s32.totalorder %s4237_s30, 0 }
 0x1b5   : > { %2694 = vmatpush3.bf16.msra.mxu0 %v3127_v6  ;;  %v3171_v17 = vld [vmem:[#allocation2 + $0x20] ss:$8 sps:$4 sm:$0xff]   ;;  %v3159_v22 = vld [vmem:[%s3820_s29 + $0x70] ss:$8 sps:$4 sm:$0xff]   ;;  %s4128_s9 = scalar_lea.hbm %s4238_s16, %s2587_s15 }
 0x1b6   : > { %2695 = vmatprep.subr.bf16.mxu0 %v3128_v49  ;;  %v3156_v20 = vld [vmem:[%s3820_s29 + $0x60] ss:$8 sps:$4 sm:$0xff]   ;;  %v3172_v23 = vld [vmem:[#allocation2 + $0x90] ss:$8 sps:$4 sm:$0xff]   ;;  %p3370_p12 = pnand %p3369_p3, %p4239_p10  ;;  %s3372_s29 = sshll.u32 %s3501_s11, 4  ;;  %s3373_s29 = int_to_ptr.vmem [resolvable:$false] %s3372_s29 }
 0x1b7   : > { %2754 = vmatpush3.bf16.xpose.msra.mxu1 %v3163_v63  ;;  %v3173_v24 = vld [vmem:[#allocation2 + $0x10] ss:$8 sps:$4 sm:$0xff]   ;;  %v3174_v25 = vld [vmem:[#allocation2 + $0x80] ss:$8 sps:$4 sm:$0xff]   ;;  %s3374_s7 = scalar_lea.vmem %s3373_s29, 2048  ;;  %p3375_p4 = scmp.lt.s32.totalorder %s4130_s14, %s3373_s29 }
 0x1b8   : > { %2755 = vmatprep.subr.bf16.mxu1 %v3164_v0  ;;  %v3175_v26 = vld [vmem:[#allocation2] ss:$8 sps:$4 sm:$0xff]   ;;  %p3371_p2 = pneg %p3370_p12  ;;  %p3376_p6 = scmp.lt.s32.totalorder %s3374_s7, %s3368_s8 }
 0x1b9   : > { %2696 = vmatpush3.bf16.msra.mxu0 %v3129_v50  ;;  %v3841_v30 = vld [vmem:[%s4197_s2] ss:$0 sm:$0xff] }
 0x1ba   : > { %2697 = vmatprep.subr.bf16.mxu0 %v3130_v51  ;;  %p3377_p5 = por %p3376_p6, %p3375_p4 }
 0x1bc   : > { %p3378_p1 = pnand %p3377_p5, %p3371_p2 }
 0x1bd   : > { %2698 = vmatpush3.bf16.msra.mxu0 %v3131_v53 }
 0x1be   : > { %2699 = vmatprep.subr.bf16.mxu0 %v3132_v54 }
 0x1bf   : > { %2756 = vmatpush3.bf16.xpose.msra.mxu1 %v3165_v3 }
 0x1c0   : > { %2757 = vmatprep.subr.bf16.mxu1 %v3166_v4 }
 0x1c1   : > { %2700 = vmatpush3.bf16.msra.mxu0 %v3133_v55 }
 0x1c2   : > { %2701 = vmatprep.subr.bf16.mxu0 %v3134_v56 }
 0x1c5   : > { %2702 = vmatpush3.bf16.msra.mxu0 %v3135_v57 }
 0x1c7   : > { %2758 = vmatpush3.bf16.xpose.msra.mxu1 %v3167_v9 }
 0x1c8   : > { %1439 = vmatmul.mubr.bf16.vlgmr.msra.gmra.mxu0 %v3136_v61  ;;  %2759 = vmatprep.subr.bf16.mxu1 %v3168_v10 }
 0x1c9   : > { %1446 = vmatprep.mubr.bf16.mxu0 %v3139_v62 }
 0x1cf   : > { %2760 = vmatpush3.bf16.xpose.msra.mxu1 %v3169_v13 }
 0x1d0   : > { %1447 = vmatmul.mubr.bf16.gmra.mxu0 %v3141_v1  ;;  %2761 = vmatprep.subr.bf16.mxu1 %v3170_v14 }
 0x1d1   : > { %1454 = vmatprep.mubr.bf16.mxu0 %v3142_v2 }
 0x1d7   : > { %2762 = vmatpush3.bf16.xpose.msra.mxu1 %v3171_v17 }
 0x1d8   : > { %1455 = vmatmul.mubr.bf16.gmra.mxu0 %v3144_v7  ;;  %2763 = vmatprep.subr.bf16.mxu1 %v3172_v23 }
 0x1d9   : > { %1462 = vmatprep.mubr.bf16.mxu0 %v3145_v8 }
 0x1df   : > { %2764 = vmatpush3.bf16.xpose.msra.mxu1 %v3173_v24 }
 0x1e0   : > { %1463 = vmatmul.mubr.bf16.gmra.mxu0 %v3147_v11  ;;  %2765 = vmatprep.subr.bf16.mxu1 %v3174_v25 }
 0x1e1   : > { %1470 = vmatprep.mubr.bf16.mxu0 %v3148_v12 }
 0x1e7   : > { %2766 = vmatpush3.bf16.xpose.msra.mxu1 %v3175_v26 }
 0x1e8   : > { %1471 = vmatmul.mubr.bf16.gmra.mxu0 %v3150_v15 }
 0x1e9   : > { %1478 = vmatprep.mubr.bf16.mxu0 %v3151_v16 }
 0x1f0   : > { %1479 = vmatmul.mubr.bf16.gmra.mxu0 %v3153_v18 }
 0x1f1   : > { %1486 = vmatprep.mubr.bf16.mxu0 %v3154_v19 }
 0x1f8   : > { %1487 = vmatmul.mubr.bf16.gmra.mxu0 %v3156_v20 }
 0x1f9   : > { %1494 = vmatprep.mubr.bf16.mxu0 %v3157_v21 }
 0x200   : > { %1495 = vmatmul.mubr.bf16.gmra.mxu0 %v3159_v22 }
 0x288   : > { %v2703_v27 = vpop.f32.mrf.mxu0 }
 0x28a   : > { %v2704_v28 = vpop.f32.mrf.mxu0 }
 0x28b   : > { %v2705_v29 = vadd.f32 %v2704_v28, %v2703_v27 }
 0x28c   : > { %v2706_v31 = vpop.f32.mrf.mxu0 }
 0x28d   : > { %v1441_v33 = vadd.f32 %v2705_v29, %v3841_v30 }
 0x28e   : > { %v2707_v32 = vpop.f32.mrf.mxu0 }
 0x28f   : > { %v2708_v34 = vadd.f32 %v2707_v32, %v2706_v31  ;;  %v1503_v38 = vmul.f32 0.125, %v1441_v33 }
 0x290   : > { %v2709_v35 = vpop.f32.mrf.mxu0 }
 0x291   : > { %v1444_v36 = vadd.f32 %v2708_v34, %v3841_v30 }
 0x292   : > { %v2710_v37 = vpop.f32.mrf.mxu0 }
 0x293   : > { %v1504_v39 = vmul.f32 0.125, %v1444_v36  ;;  %v2711_v40 = vadd.f32 %v2710_v37, %v2709_v35 }
 0x294   : > { %v2712_v41 = vpop.f32.mrf.mxu0 }
 0x295   : > { %v1519_v42 = vpack.c.bf16 %v1504_v39, %v1503_v38  ;;  %v1449_v44 = vadd.f32 %v2711_v40, %v3841_v30 }
 0x296   : > { %v2713_v43 = vpop.f32.mrf.mxu0 }
 0x297   : > { %v2714_v45 = vadd.f32 %v2713_v43, %v2712_v41  ;;  %2767 = vmatprep.mubr.bf16.mxu1 %v1519_v42  ;;  %v1505_v48 = vmul.f32 0.125, %v1449_v44 }
 0x298   : > { %v2715_v46 = vpop.f32.mrf.mxu0  ;;  %2768 = vmatmul.mubr.bf16.vlgmr.msra.gmra.mxu1 %v1519_v42 }
 0x299   : > { %v1452_v47 = vadd.f32 %v2714_v45, %v3841_v30 }
 0x29a   : > { %v2716_v5 = vpop.f32.mrf.mxu0 }
 0x29b   : > { %v1506_v6 = vmul.f32 0.125, %v1452_v47  ;;  %v2717_v49 = vadd.f32 %v2716_v5, %v2715_v46 }
 0x29c   : > { %v2718_v50 = vpop.f32.mrf.mxu0 }
 0x29d   : > { %v1520_v51 = vpack.c.bf16 %v1506_v6, %v1505_v48  ;;  %v1457_v53 = vadd.f32 %v2717_v49, %v3841_v30 }
 0x29e   : > { %v2719_v52 = vpop.f32.mrf.mxu0 }
 0x29f   : > { %v2720_v54 = vadd.f32 %v2719_v52, %v2718_v50  ;;  %2769 = vmatprep.mubr.bf16.mxu1 %v1520_v51  ;;  %v1507_v58 = vmul.f32 0.125, %v1457_v53 }
 0x2a0   : > { %v2721_v55 = vpop.f32.mrf.mxu0  ;;  %2770 = vmatmul.mubr.bf16.gmra.mxu1 %v1520_v51 }
 0x2a1   : > { %v1460_v56 = vadd.f32 %v2720_v54, %v3841_v30 }
 0x2a2   : > { %v2722_v57 = vpop.f32.mrf.mxu0 }
 0x2a3   : > { %v1508_v59 = vmul.f32 0.125, %v1460_v56  ;;  %v2723_v60 = vadd.f32 %v2722_v57, %v2721_v55 }
 0x2a4   : > { %v2724_v61 = vpop.f32.mrf.mxu0 }
 0x2a5   : > { %v1521_v62 = vpack.c.bf16 %v1508_v59, %v1507_v58  ;;  %v1465_v0 = vadd.f32 %v2723_v60, %v3841_v30 }
 0x2a6   : > { %v2725_v63 = vpop.f32.mrf.mxu0 }
 0x2a7   : > { %v2726_v1 = vadd.f32 %v2725_v63, %v2724_v61  ;;  %2771 = vmatprep.mubr.bf16.mxu1 %v1521_v62  ;;  %v1509_v7 = vmul.f32 0.125, %v1465_v0 }
 0x2a8   : > { %v2727_v2 = vpop.f32.mrf.mxu0  ;;  %2772 = vmatmul.mubr.bf16.gmra.mxu1 %v1521_v62 }
 0x2a9   : > { %v1468_v3 = vadd.f32 %v2726_v1, %v3841_v30 }
 0x2aa   : > { %v2728_v4 = vpop.f32.mrf.mxu0 }
 0x2ab   : > { %v1510_v8 = vmul.f32 0.125, %v1468_v3  ;;  %v2729_v9 = vadd.f32 %v2728_v4, %v2727_v2 }
 0x2ac   : > { %v2730_v10 = vpop.f32.mrf.mxu0 }
 0x2ad   : > { %v1522_v11 = vpack.c.bf16 %v1510_v8, %v1509_v7  ;;  %v1473_v13 = vadd.f32 %v2729_v9, %v3841_v30 }
 0x2ae   : > { %v2731_v12 = vpop.f32.mrf.mxu0 }
 0x2af   : > { %v2732_v14 = vadd.f32 %v2731_v12, %v2730_v10  ;;  %2773 = vmatprep.mubr.bf16.mxu1 %v1522_v11  ;;  %v1511_v18 = vmul.f32 0.125, %v1473_v13 }
 0x2b0   : > { %v2733_v15 = vpop.f32.mrf.mxu0  ;;  %2774 = vmatmul.mubr.bf16.gmra.mxu1 %v1522_v11 }
 0x2b1   : > { %v1476_v16 = vadd.f32 %v2732_v14, %v3841_v30 }
 0x2b2   : > { %v2734_v17 = vpop.f32.mrf.mxu0 }
 0x2b3   : > { %v1512_v19 = vmul.f32 0.125, %v1476_v16  ;;  %v2735_v20 = vadd.f32 %v2734_v17, %v2733_v15 }
 0x2b4   : > { %v2736_v21 = vpop.f32.mrf.mxu0 }
 0x2b5   : > { %v1523_v22 = vpack.c.bf16 %v1512_v19, %v1511_v18  ;;  %v1481_v24 = vadd.f32 %v2735_v20, %v3841_v30 }
 0x2b6   : > { %v2737_v23 = vpop.f32.mrf.mxu0 }
 0x2b7   : > { %v2738_v25 = vadd.f32 %v2737_v23, %v2736_v21  ;;  %2775 = vmatprep.mubr.bf16.mxu1 %v1523_v22  ;;  %v1513_v29 = vmul.f32 0.125, %v1481_v24 }
 0x2b8   : > { %v2739_v26 = vpop.f32.mrf.mxu0  ;;  %2776 = vmatmul.mubr.bf16.gmra.mxu1 %v1523_v22 }
 0x2b9   : > { %v1484_v27 = vadd.f32 %v2738_v25, %v3841_v30 }
 0x2ba   : > { %v2740_v28 = vpop.f32.mrf.mxu0 }
 0x2bb   : > { %v1514_v31 = vmul.f32 0.125, %v1484_v27  ;;  %v2741_v32 = vadd.f32 %v2740_v28, %v2739_v26 }
 0x2bc   : > { %v2742_v33 = vpop.f32.mrf.mxu0 }
 0x2bd   : > { %v1524_v34 = vpack.c.bf16 %v1514_v31, %v1513_v29  ;;  %v1489_v36 = vadd.f32 %v2741_v32, %v3841_v30 }
 0x2be   : > { %v2743_v35 = vpop.f32.mrf.mxu0 }
 0x2bf   : > { %v2744_v37 = vadd.f32 %v2743_v35, %v2742_v33  ;;  %2777 = vmatprep.mubr.bf16.mxu1 %v1524_v34  ;;  %v1515_v41 = vmul.f32 0.125, %v1489_v36 }
 0x2c0   : > { %v2745_v38 = vpop.f32.mrf.mxu0  ;;  %2778 = vmatmul.mubr.bf16.gmra.mxu1 %v1524_v34 }
 0x2c1   : > { %v1492_v39 = vadd.f32 %v2744_v37, %v3841_v30  ;;  %v3176_v37 = vld [vmem:[#allocation2 + $0xf4] ss:$8 sps:$4 sm:$0xff]  }
 0x2c2   : > { %v2746_v40 = vpop.f32.mrf.mxu0  ;;  %2783 = vmatprep.subr.bf16.mxu0 %v3176_v37  ;;  %2879 = vmatprep.subr.bf16.mxu1 %v3176_v37 }
 0x2c3   : > { %v1516_v42 = vmul.f32 0.125, %v1492_v39  ;;  %v2747_v43 = vadd.f32 %v2746_v40, %v2745_v38  ;;  %v3177_v38 = vld [vmem:[#allocation2 + $0x74] ss:$8 sps:$4 sm:$0xff]   ;;  %v3178_v39 = vld [vmem:[#allocation2 + $0xe4] ss:$8 sps:$4 sm:$0xff]  }
 0x2c4   : > { %v2748_v44 = vpop.f32.mrf.mxu0  ;;  %2784 = vmatpush3.bf16.msra.mxu0 %v3177_v38  ;;  %v3179_v40 = vld [vmem:[#allocation2 + $0x64] ss:$8 sps:$4 sm:$0xff]   ;;  %2887 = vmatpush3.bf16.msra.mxu1 %v3177_v38 }
 0x2c5   : > { %v1525_v45 = vpack.c.bf16 %v1516_v42, %v1515_v41  ;;  %v1497_v47 = vadd.f32 %v2747_v43, %v3841_v30  ;;  %2785 = vmatprep.subr.bf16.mxu0 %v3178_v39  ;;  %v3180_v41 = vld [vmem:[#allocation2 + $0xd4] ss:$8 sps:$4 sm:$0xff]   ;;  %2880 = vmatprep.subr.bf16.mxu1 %v3178_v39  ;;  %v3182_v43 = vld [vmem:[#allocation2 + $0xc4] ss:$8 sps:$4 sm:$0xff]  }
 0x2c6   : > { %v2749_v46 = vpop.f32.mrf.mxu0  ;;  %v3181_v42 = vld [vmem:[#allocation2 + $0x54] ss:$8 sps:$4 sm:$0xff]  }
 0x2c7   : > { %v2750_v5 = vadd.f32 %v2749_v46, %v2748_v44  ;;  %2779 = vmatprep.mubr.bf16.mxu1 %v1525_v45  ;;  %v1517_v6 = vmul.f32 0.125, %v1497_v47  ;;  %v3183_v44 = vld [vmem:[#allocation2 + $0x44] ss:$8 sps:$4 sm:$0xff]  }
 0x2c8   : > { %2780 = vmatmul.mubr.bf16.gmra.mxu1 %v1525_v45  ;;  %2786 = vmatpush3.bf16.msra.mxu0 %v3179_v40 }
 0x2c9   : > { %v1500_v48 = vadd.f32 %v2750_v5, %v3841_v30  ;;  %2888 = vmatpush3.bf16.msra.mxu1 %v3179_v40  ;;  %2787 = vmatprep.subr.bf16.mxu0 %v3180_v41 }
 0x2ca   : > { %2881 = vmatprep.subr.bf16.mxu1 %v3180_v41 }
 0x2cb   : > { %v1518_v49 = vmul.f32 0.125, %v1500_v48 }
 0x2cc   : > { %2788 = vmatpush3.bf16.msra.mxu0 %v3181_v42 }
 0x2cd   : > { %v1526_v50 = vpack.c.bf16 %v1518_v49, %v1517_v6  ;;  %2889 = vmatpush3.bf16.msra.mxu1 %v3181_v42  ;;  %2789 = vmatprep.subr.bf16.mxu0 %v3182_v43 }
 0x2ce   : > { %2882 = vmatprep.subr.bf16.mxu1 %v3182_v43 }
 0x2cf   : > { %2781 = vmatprep.mubr.bf16.mxu1 %v1526_v50 }
 0x2d0   : > { %2782 = vmatmul.mubr.bf16.gmra.mxu1 %v1526_v50  ;;  %2790 = vmatpush3.bf16.msra.mxu0 %v3183_v44 }
 0x2d1   : > { %2890 = vmatpush3.bf16.msra.mxu1 %v3183_v44 }
 0x358   : > { %v3859_v51 = vpop.f32.mrf.mxu1 }
 0x35a   : > { %v3861_v52 = vpop.f32.mrf.mxu1 }
 0x35b   : > { %v1736_v53 = vmax.f32 %v3859_v51, %v3861_v52 }
 0x35c   : > { %v3865_v54 = vpop.f32.mrf.mxu1 }
 0x35d   : > { %1737 = vmax.xlane.f32.xlu0 %v1736_v53 }
 0x35e   : > { %v3867_v55 = vpop.f32.mrf.mxu1 }
 0x35f   : > { %v1739_v30 = vmax.f32 %v3865_v54, %v3867_v55 }
 0x360   : > { %v3871_v56 = vpop.f32.mrf.mxu1 }
 0x361   : > { %1740 = vmax.xlane.f32.xlu0 %v1739_v30 }
 0x362   : > { %v3873_v57 = vpop.f32.mrf.mxu1 }
 0x363   : > { %v1742_v58 = vmax.f32 %v3871_v56, %v3873_v57 }
 0x364   : > { %v3877_v59 = vpop.f32.mrf.mxu1 }
 0x365   : > { %1743 = vmax.xlane.f32.xlu1 %v1742_v58 }
 0x366   : > { %v3879_v60 = vpop.f32.mrf.mxu1 }
 0x367   : > { %v1745_v61 = vmax.f32 %v3877_v59, %v3879_v60 }
 0x368   : > { %v3883_v62 = vpop.f32.mrf.mxu1 }
 0x369   : > { %1746 = vmax.xlane.f32.xlu1 %v1745_v61 }
 0x36a   : > { %v3885_v63 = vpop.f32.mrf.mxu1 }
 0x36b   : > { %v1748_v0 = vmax.f32 %v3883_v62, %v3885_v63 }
 0x36c   : > { %v3889_v1 = vpop.f32.mrf.mxu1 }
 0x36d   : > { %1749 = vmax.xlane.f32.xlu0 %v1748_v0 }
 0x36e   : > { %v3891_v2 = vpop.f32.mrf.mxu1 }
 0x36f   : > { %v1751_v3 = vmax.f32 %v3889_v1, %v3891_v2 }
 0x370   : > { %v3895_v4 = vpop.f32.mrf.mxu1 }
 0x371   : > { %1752 = vmax.xlane.f32.xlu1 %v1751_v3 }
 0x372   : > { %v3897_v7 = vpop.f32.mrf.mxu1 }
 0x373   : > { %v1754_v8 = vmax.f32 %v3895_v4, %v3897_v7 }
 0x374   : > { %v3901_v9 = vpop.f32.mrf.mxu1 }
 0x375   : > { %1755 = vmax.xlane.f32.xlu0 %v1754_v8 }
 0x376   : > { %v3903_v10 = vpop.f32.mrf.mxu1 }
 0x377   : > { %v1757_v11 = vmax.f32 %v3901_v9, %v3903_v10 }
 0x378   : > { %v3907_v12 = vpop.f32.mrf.mxu1 }
 0x379   : > { %1758 = vmax.xlane.f32.xlu1 %v1757_v11 }
 0x37a   : > { %v3909_v13 = vpop.f32.mrf.mxu1 }
 0x37b   : > { %v1760_v14 = vmax.f32 %v3907_v12, %v3909_v13 }
 0x37c   : > { %v3913_v15 = vpop.f32.mrf.mxu1 }
 0x37d   : > { %1761 = vmax.xlane.f32.xlu0 %v1760_v14 }
 0x37e   : > { %v3915_v16 = vpop.f32.mrf.mxu1 }
 0x37f   : > { %v1763_v17 = vmax.f32 %v3913_v15, %v3915_v16 }
 0x380   : > { %v3919_v18 = vpop.f32.mrf.mxu1 }
 0x381   : > { %1764 = vmax.xlane.f32.xlu1 %v1763_v17 }
 0x382   : > { %v3921_v19 = vpop.f32.mrf.mxu1 }
 0x383   : > { %v1766_v27 = vmax.f32 %v3919_v18, %v3921_v19 }
 0x384   : > { %v3923_v20 = vpop.f32.mrf.mxu1 }
 0x386   : > { %v3925_v21 = vpop.f32.mrf.mxu1 }
 0x387   : > { %v1769_v32 = vmax.f32 %v3923_v20, %v3925_v21 }
 0x388   : > { %v3927_v22 = vpop.f32.mrf.mxu1 }
 0x38a   : > { %v3929_v23 = vpop.f32.mrf.mxu1 }
 0x38b   : > { %v1772_v24 = vmax.f32 %v3927_v22, %v3929_v23 }
 0x38c   : > { %v3933_v25 = vpop.f32.mrf.mxu1 }
 0x38d   : > { %1773 = vmax.xlane.f32.xlu0 %v1772_v24 }
 0x38e   : > { %v3935_v26 = vpop.f32.mrf.mxu1 }
 0x38f   : > { %v1775_v28 = vmax.f32 %v3933_v25, %v3935_v26 }
 0x390   : > { %v3941_v29 = vpop.f32.mrf.mxu1 }
 0x391   : > { %1767 = vmax.xlane.f32.xlu0 %v1766_v27  ;;  %1776 = vmax.xlane.f32.xlu1 %v1775_v28 }
 0x392   : > { %v3943_v31 = vpop.f32.mrf.mxu1 }
 0x393   : > { %v1778_v33 = vmax.f32 %v3941_v29, %v3943_v31 }
 0x394   : > { %v3949_v34 = vpop.f32.mrf.mxu1 }
 0x395   : > { %1770 = vmax.xlane.f32.xlu1 %v1769_v32  ;;  %1779 = vmax.xlane.f32.xlu0 %v1778_v33 }
 0x396   : > { %v3951_v35 = vpop.f32.mrf.mxu1 }
 0x397   : > { %v1781_v36 = vmax.f32 %v3949_v34, %v3951_v35 }
 0x399   : > { %1782 = vmax.xlane.f32.xlu1 %v1781_v36 }
 0x3e6   : > { %v1738_v45 = vpop.xlane.xlu0 %1737 }
 0x3e7   : > { %v1784_v46 = vsub.f32 %v3859_v51, %v1738_v45  ;;  %v1785_v47 = vsub.f32 %v3861_v52, %v1738_v45 }
 0x3e9   : > { %v1816_v5 = vmul.f32 1.442695, %v1784_v46  ;;  %v1818_v48 = vmul.f32 1.442695, %v1785_v47 }
 0x3ea   : > { %v1741_v6 = vpop.xlane.xlu0 %1740 }
 0x3eb   : > { %3192 = vpow2.f32 %v1816_v5  ;;  %v1786_v49 = vsub.f32 %v3865_v54, %v1741_v6  ;;  %v1787_v50 = vsub.f32 %v3867_v55, %v1741_v6 }
 0x3ec   : > { %3194 = vpow2.f32 %v1818_v48 }
 0x3ed   : > { %v1820_v53 = vmul.f32 1.442695, %v1786_v49  ;;  %v1822_v30 = vmul.f32 1.442695, %v1787_v50 }
 0x3ee   : > { %v1744_v58 = vpop.xlane.xlu1 %1743 }
 0x3ef   : > { %3196 = vpow2.f32 %v1820_v53  ;;  %v1788_v61 = vsub.f32 %v3871_v56, %v1744_v58  ;;  %v1789_v0 = vsub.f32 %v3873_v57, %v1744_v58 }
 0x3f0   : > { %3198 = vpow2.f32 %v1822_v30 }
 0x3f1   : > { %v1824_v51 = vmul.f32 1.442695, %v1788_v61  ;;  %v1826_v52 = vmul.f32 1.442695, %v1789_v0 }
 0x3f2   : > { %v1747_v3 = vpop.xlane.xlu1 %1746 }
 0x3f3   : > { %3200 = vpow2.f32 %v1824_v51  ;;  %v1790_v8 = vsub.f32 %v3877_v59, %v1747_v3  ;;  %v1791_v54 = vsub.f32 %v3879_v60, %v1747_v3  ;;  %v3184_v51 = vld [vmem:[#allocation2 + $0xb4] ss:$8 sps:$4 sm:$0xff]  }
 0x3f4   : > { %3202 = vpow2.f32 %v1826_v52  ;;  %v3185_v52 = vld [vmem:[#allocation2 + $0x34] ss:$8 sps:$4 sm:$0xff]   ;;  %2791 = vmatprep.subr.bf16.mxu0 %v3184_v51  ;;  %2883 = vmatprep.subr.bf16.mxu1 %v3184_v51 }
 0x3f5   : > { %v1828_v55 = vmul.f32 1.442695, %v1790_v8  ;;  %v1830_v11 = vmul.f32 1.442695, %v1791_v54  ;;  %2792 = vmatpush3.bf16.msra.mxu0 %v3185_v52  ;;  %2891 = vmatpush3.bf16.msra.mxu1 %v3185_v52 }
 0x3f6   : > { %v1750_v14 = vpop.xlane.xlu0 %1749 }
 0x3f7   : > { %3204 = vpow2.f32 %v1828_v55  ;;  %v1792_v17 = vsub.f32 %v3883_v62, %v1750_v14  ;;  %v1793_v56 = vsub.f32 %v3885_v63, %v1750_v14  ;;  %v3186_v14 = vld [vmem:[#allocation2 + $0xa4] ss:$8 sps:$4 sm:$0xff]  }
 0x3f8   : > { %v3965_v24 = vpop.eup %3192  ;;  %3206 = vpow2.f32 %v1830_v11  ;;  %2793 = vmatprep.subr.bf16.mxu0 %v3186_v14  ;;  %2884 = vmatprep.subr.bf16.mxu1 %v3186_v14 }
 0x3f9   : > { %v3967_v57 = vpop.eup %3194  ;;  %v1832_v27 = vmul.f32 1.442695, %v1792_v17  ;;  %v1834_v28 = vmul.f32 1.442695, %v1793_v56  ;;  %v3187_v56 = vld [vmem:[#allocation2 + $0x24] ss:$8 sps:$4 sm:$0xff]  }
 0x3fa   : > { %v1753_v32 = vpop.xlane.xlu1 %1752  ;;  %v1880_v59 = vadd.f32 %v3967_v57, %v3965_v24  ;;  %2794 = vmatpush3.bf16.msra.mxu0 %v3187_v56  ;;  %2892 = vmatpush3.bf16.msra.mxu1 %v3187_v56 }
 0x3fb   : > { %3208 = vpow2.f32 %v1832_v27  ;;  %v1794_v60 = vsub.f32 %v3889_v1, %v1753_v32  ;;  %v1795_v33 = vsub.f32 %v3891_v2, %v1753_v32  ;;  %v3188_v27 = vld [vmem:[#allocation2 + $0x94] ss:$8 sps:$4 sm:$0xff]  }
 0x3fc   : > { %v3973_v36 = vpop.eup %3196  ;;  %3210 = vpow2.f32 %v1834_v28  ;;  %1881 = vadd.xlane.f32.xlu0 %v1880_v59  ;;  %2795 = vmatprep.subr.bf16.mxu0 %v3188_v27 }
 0x3fd   : > { %v3975_v62 = vpop.eup %3198  ;;  %v1836_v63 = vmul.f32 1.442695, %v1794_v60  ;;  %v1838_v37 = vmul.f32 1.442695, %v1795_v33  ;;  %v3189_v33 = vld [vmem:[#allocation2 + $0x14] ss:$8 sps:$4 sm:$0xff]   ;;  %2885 = vmatprep.subr.bf16.mxu1 %v3188_v27 }
 0x3fe   : > { %v1756_v38 = vpop.xlane.xlu0 %1755  ;;  %v1883_v39 = vadd.f32 %v3975_v62, %v3973_v36  ;;  %2796 = vmatpush3.bf16.msra.mxu0 %v3189_v33  ;;  %2893 = vmatpush3.bf16.msra.mxu1 %v3189_v33 }
 0x3ff   : > { %3212 = vpow2.f32 %v1836_v63  ;;  %v1796_v40 = vsub.f32 %v3895_v4, %v1756_v38  ;;  %v1797_v41 = vsub.f32 %v3897_v7, %v1756_v38  ;;  %v3190_v63 = vld [vmem:[#allocation2 + $0x84] ss:$8 sps:$4 sm:$0xff]  }
 0x400   : > { %v3981_v1 = vpop.eup %3200  ;;  %3214 = vpow2.f32 %v1838_v37  ;;  %1884 = vadd.xlane.f32.xlu1 %v1883_v39  ;;  %2797 = vmatprep.subr.bf16.mxu0 %v3190_v63 }
 0x401   : > { %v3983_v2 = vpop.eup %3202  ;;  %v1840_v42 = vmul.f32 1.442695, %v1796_v40  ;;  %v1842_v43 = vmul.f32 1.442695, %v1797_v41  ;;  %2886 = vmatprep.subr.bf16.mxu1 %v3190_v63 }
 0x402   : > { %v1759_v44 = vpop.xlane.xlu1 %1758  ;;  %v1886_v45 = vadd.f32 %v3983_v2, %v3981_v1 }
 0x403   : > { %3216 = vpow2.f32 %v1840_v42  ;;  %v1798_v46 = vsub.f32 %v3901_v9, %v1759_v44  ;;  %v1799_v47 = vsub.f32 %v3903_v10, %v1759_v44 }
 0x404   : > { %v3989_v4 = vpop.eup %3204  ;;  %3218 = vpow2.f32 %v1842_v43  ;;  %1887 = vadd.xlane.f32.xlu0 %v1886_v45 }
 0x405   : > { %v3991_v7 = vpop.eup %3206  ;;  %v1844_v5 = vmul.f32 1.442695, %v1798_v46  ;;  %v1846_v48 = vmul.f32 1.442695, %v1799_v47  ;;  %v3191_v46 = vld [vmem:[#allocation2 + $0x4] ss:$8 sps:$4 sm:$0xff]  }
 0x406   : > { %v1762_v6 = vpop.xlane.xlu0 %1761  ;;  %v1889_v49 = vadd.f32 %v3991_v7, %v3989_v4  ;;  %2798 = vmatpush3.bf16.msra.mxu0 %v3191_v46  ;;  %2894 = vmatpush3.bf16.msra.mxu1 %v3191_v46 }
 0x407   : > { %3220 = vpow2.f32 %v1844_v5  ;;  %v1800_v50 = vsub.f32 %v3907_v12, %v1762_v6  ;;  %v1801_v53 = vsub.f32 %v3909_v13, %v1762_v6 }
 0x408   : > { %v3997_v9 = vpop.eup %3208  ;;  %3222 = vpow2.f32 %v1846_v48  ;;  %1890 = vadd.xlane.f32.xlu1 %v1889_v49 }
 0x409   : > { %v3999_v10 = vpop.eup %3210  ;;  %v1848_v30 = vmul.f32 1.442695, %v1800_v50  ;;  %v1850_v58 = vmul.f32 1.442695, %v1801_v53 }
 0x40a   : > { %v1765_v61 = vpop.xlane.xlu1 %1764  ;;  %v1892_v0 = vadd.f32 %v3999_v10, %v3997_v9 }
 0x40b   : > { %3224 = vpow2.f32 %v1848_v30  ;;  %v1802_v3 = vsub.f32 %v3913_v15, %v1765_v61  ;;  %v1803_v12 = vsub.f32 %v3915_v16, %v1765_v61 }
 0x40c   : > { %v4005_v13 = vpop.eup %3212  ;;  %3226 = vpow2.f32 %v1850_v58  ;;  %1893 = vadd.xlane.f32.xlu0 %v1892_v0 }
 0x40d   : > { %v4007_v8 = vpop.eup %3214  ;;  %v1852_v54 = vmul.f32 1.442695, %v1802_v3  ;;  %v1854_v55 = vmul.f32 1.442695, %v1803_v12 }
 0x40e   : > { %v1895_v11 = vadd.f32 %v4007_v8, %v4005_v13 }
 0x40f   : > { %3228 = vpow2.f32 %v1852_v54 }
 0x410   : > { %v4011_v15 = vpop.eup %3216  ;;  %3230 = vpow2.f32 %v1854_v55  ;;  %1896 = vadd.xlane.f32.xlu1 %v1895_v11 }
 0x411   : > { %v4013_v16 = vpop.eup %3218 }
 0x412   : > { %v1898_v17 = vadd.f32 %v4013_v16, %v4011_v15 }
 0x414   : > { %v4017_v28 = vpop.eup %3220  ;;  %1899 = vadd.xlane.f32.xlu0 %v1898_v17 }
 0x415   : > { %v4019_v32 = vpop.eup %3222 }
 0x416   : > { %v1774_v59 = vpop.xlane.xlu0 %1773  ;;  %v1901_v60 = vadd.f32 %v4019_v32, %v4017_v28 }
 0x417   : > { %v1808_v37 = vsub.f32 %v3927_v22, %v1774_v59  ;;  %v1809_v38 = vsub.f32 %v3929_v23, %v1774_v59 }
 0x418   : > { %v4025_v39 = vpop.eup %3224  ;;  %1902 = vadd.xlane.f32.xlu1 %v1901_v60 }
 0x419   : > { %v4027_v40 = vpop.eup %3226  ;;  %v1864_v41 = vmul.f32 1.442695, %v1808_v37  ;;  %v1866_v42 = vmul.f32 1.442695, %v1809_v38 }
 0x41a   : > { %v1768_v43 = vpop.xlane.xlu0 %1767  ;;  %v1777_v44 = vpop.xlane.xlu1 %1776  ;;  %v1904_v45 = vadd.f32 %v4027_v40, %v4025_v39 }
 0x41b   : > { %3232 = vpow2.f32 %v1864_v41  ;;  %v1804_v22 = vsub.f32 %v3919_v18, %v1768_v43  ;;  %v1805_v23 = vsub.f32 %v3921_v19, %v1768_v43  ;;  %v1810_v47 = vsub.f32 %v3933_v25, %v1777_v44 }
 0x41c   : > { %v4034_v5 = vpop.eup %3228  ;;  %3234 = vpow2.f32 %v1866_v42  ;;  %v1811_v48 = vsub.f32 %v3935_v26, %v1777_v44  ;;  %1905 = vadd.xlane.f32.xlu0 %v1904_v45 }
 0x41d   : > { %v4037_v6 = vpop.eup %3230  ;;  %v1856_v49 = vmul.f32 1.442695, %v1804_v22  ;;  %v1858_v50 = vmul.f32 1.442695, %v1805_v23  ;;  %v1868_v53 = vmul.f32 1.442695, %v1810_v47 }
 0x41e   : > { %v1870_v30 = vmul.f32 1.442695, %v1811_v48  ;;  %v1771_v58 = vpop.xlane.xlu1 %1770  ;;  %v1780_v18 = vpop.xlane.xlu0 %1779  ;;  %v1907_v19 = vadd.f32 %v4037_v6, %v4034_v5 }
 0x41f   : > { %3236 = vpow2.f32 %v1856_v49  ;;  %v1806_v25 = vsub.f32 %v3923_v20, %v1771_v58  ;;  %v1807_v61 = vsub.f32 %v3925_v21, %v1771_v58  ;;  %v1812_v26 = vsub.f32 %v3941_v29, %v1780_v18 }
 0x420   : > { %3238 = vpow2.f32 %v1858_v50  ;;  %v1813_v0 = vsub.f32 %v3943_v31, %v1780_v18  ;;  %1908 = vadd.xlane.f32.xlu1 %v1907_v19 }
 0x421   : > { %3240 = vpow2.f32 %v1868_v53  ;;  %v1860_v51 = vmul.f32 1.442695, %v1806_v25  ;;  %v1862_v52 = vmul.f32 1.442695, %v1807_v61  ;;  %v1872_v3 = vmul.f32 1.442695, %v1812_v26 }
 0x422   : > { %3242 = vpow2.f32 %v1870_v30  ;;  %v1874_v12 = vmul.f32 1.442695, %v1813_v0  ;;  %v1783_v54 = vpop.xlane.xlu1 %1782 }
 0x423   : > { %3244 = vpow2.f32 %v1860_v51  ;;  %v1814_v55 = vsub.f32 %v3949_v34, %v1783_v54  ;;  %v1815_v20 = vsub.f32 %v3951_v35, %v1783_v54 }
 0x424   : > { %3246 = vpow2.f32 %v1862_v52 }
 0x425   : > { %3248 = vpow2.f32 %v1872_v3  ;;  %v1876_v21 = vmul.f32 1.442695, %v1814_v55  ;;  %v1878_v29 = vmul.f32 1.442695, %v1815_v20 }
 0x426   : > { %3250 = vpow2.f32 %v1874_v12 }
 0x427   : > { %3252 = vpow2.f32 %v1876_v21 }
 0x428   : > { %v4047_v31 = vpop.eup %3232  ;;  %3254 = vpow2.f32 %v1878_v29 }
 0x429   : > { %v4049_v11 = vpop.eup %3234 }
 0x42a   : > { %v1916_v14 = vadd.f32 %v4049_v11, %v4047_v31 }
 0x42c   : > { %v4053_v17 = vpop.eup %3236  ;;  %1917 = vadd.xlane.f32.xlu0 %v1916_v14 }
 0x42d   : > { %v4055_v34 = vpop.eup %3238 }
 0x42e   : > { %v4057_v35 = vpop.eup %3240  ;;  %v1910_v56 = vadd.f32 %v4055_v34, %v4053_v17 }
 0x42f   : > { %v4061_v27 = vpop.eup %3242 }
 0x430   : > { %v4063_v59 = vpop.eup %3244  ;;  %1911 = vadd.xlane.f32.xlu0 %v1910_v56  ;;  %v1919_v60 = vadd.f32 %v4061_v27, %v4057_v35 }
 0x431   : > { %v4067_v33 = vpop.eup %3246 }
 0x432   : > { %v4069_v63 = vpop.eup %3248  ;;  %1920 = vadd.xlane.f32.xlu1 %v1919_v60  ;;  %v1913_v37 = vadd.f32 %v4067_v33, %v4063_v59 }
 0x433   : > { %v4073_v38 = vpop.eup %3250 }
 0x434   : > { %v4075_v41 = vpop.eup %3252  ;;  %v1922_v42 = vadd.f32 %v4073_v38, %v4069_v63 }
 0x435   : > { %v4079_v43 = vpop.eup %3254 }
 0x436   : > { %1923 = vadd.xlane.f32.xlu0 %v1922_v42  ;;  %1914 = vadd.xlane.f32.xlu1 %v1913_v37  ;;  %v1925_v44 = vadd.f32 %v4079_v43, %v4075_v41 }
 0x43a   : > { %1926 = vadd.xlane.f32.xlu1 %v1925_v44 }
 0x485   : > { %v1882_v45 = vpop.xlane.xlu0 %1881 }
 0x486   : > { %3256 = vrcp.f32 %v1882_v45 }
 0x489   : > { %v1885_v46 = vpop.xlane.xlu1 %1884 }
 0x48a   : > { %3258 = vrcp.f32 %v1885_v46 }
 0x48d   : > { %v1888_v22 = vpop.xlane.xlu0 %1887 }
 0x48e   : > { %3260 = vrcp.f32 %v1888_v22 }
 0x491   : > { %v1891_v23 = vpop.xlane.xlu1 %1890 }
 0x492   : > { %3262 = vrcp.f32 %v1891_v23 }
 0x493   : > { %v3257_v47 = vpop.eup %3256 }
 0x494   : > { %v1945_v50 = vmul.f32 %v3257_v47, %v3967_v57  ;;  %v1944_v30 = vmul.f32 %v3257_v47, %v3965_v24 }
 0x495   : > { %v1894_v48 = vpop.xlane.xlu0 %1893 }
 0x496   : > { %3264 = vrcp.f32 %v1894_v48 }
 0x497   : > { %v3259_v49 = vpop.eup %3258 }
 0x498   : > { %v1947_v53 = vmul.f32 %v3259_v49, %v3975_v62  ;;  %v1946_v58 = vmul.f32 %v3259_v49, %v3973_v36 }
 0x499   : > { %v1897_v18 = vpop.xlane.xlu1 %1896 }
 0x49a   : > { %3266 = vrcp.f32 %v1897_v18  ;;  %v1977_v19 = vpack.c.bf16 %v1947_v53, %v1945_v50  ;;  %v1976_v25 = vpack.c.bf16 %v1946_v58, %v1944_v30 }
 0x49b   : > { %v3261_v61 = vpop.eup %3260 }
 0x49c   : > { %2120 = vmatprep.mubr.bf16.mxu0 %v1977_v19  ;;  %v1949_v51 = vmul.f32 %v3261_v61, %v3983_v2  ;;  %v1948_v62 = vmul.f32 %v3261_v61, %v3981_v1 }
 0x49d   : > { %v1900_v26 = vpop.xlane.xlu0 %1899  ;;  %2121 = vmatmul.mubr.bf16.vlgmr.msra.gmra.mxu0 %v1976_v25 }
 0x49e   : > { %3268 = vrcp.f32 %v1900_v26 }
 0x49f   : > { %v3263_v0 = vpop.eup %3262 }
 0x4a0   : > { %v1951_v57 = vmul.f32 %v3263_v0, %v3991_v7  ;;  %v1950_v24 = vmul.f32 %v3263_v0, %v3989_v4 }
 0x4a1   : > { %v1903_v52 = vpop.xlane.xlu1 %1902 }
 0x4a2   : > { %3270 = vrcp.f32 %v1903_v52  ;;  %v1979_v36 = vpack.c.bf16 %v1951_v57, %v1949_v51  ;;  %v1978_v3 = vpack.c.bf16 %v1950_v24, %v1948_v62 }
 0x4a3   : > { %v3265_v12 = vpop.eup %3264 }
 0x4a4   : > { %2128 = vmatprep.mubr.bf16.mxu0 %v1979_v36  ;;  %v1953_v20 = vmul.f32 %v3265_v12, %v3999_v10  ;;  %v1952_v7 = vmul.f32 %v3265_v12, %v3997_v9 }
 0x4a5   : > { %v1906_v54 = vpop.xlane.xlu0 %1905  ;;  %2129 = vmatmul.mubr.bf16.gmra.mxu0 %v1978_v3 }
 0x4a6   : > { %3272 = vrcp.f32 %v1906_v54 }
 0x4a7   : > { %v3267_v55 = vpop.eup %3266 }
 0x4a8   : > { %v1955_v2 = vmul.f32 %v3267_v55, %v4007_v8  ;;  %v1954_v1 = vmul.f32 %v3267_v55, %v4005_v13 }
 0x4a9   : > { %v1909_v21 = vpop.xlane.xlu1 %1908 }
 0x4aa   : > { %3274 = vrcp.f32 %v1909_v21  ;;  %v1981_v4 = vpack.c.bf16 %v1955_v2, %v1953_v20  ;;  %v1980_v29 = vpack.c.bf16 %v1954_v1, %v1952_v7 }
 0x4ab   : > { %v3269_v14 = vpop.eup %3268 }
 0x4ac   : > { %2136 = vmatprep.mubr.bf16.mxu0 %v1981_v4  ;;  %v1957_v60 = vmul.f32 %v3269_v14, %v4013_v16  ;;  %v1956_v10 = vmul.f32 %v3269_v14, %v4011_v15 }
 0x4ad   : > { %2137 = vmatmul.mubr.bf16.gmra.mxu0 %v1980_v29 }
 0x4af   : > { %v3271_v56 = vpop.eup %3270 }
 0x4b0   : > { %v1959_v37 = vmul.f32 %v3271_v56, %v4019_v32  ;;  %v1958_v8 = vmul.f32 %v3271_v56, %v4017_v28 }
 0x4b2   : > { %v1983_v42 = vpack.c.bf16 %v1959_v37, %v1957_v60  ;;  %v1982_v9 = vpack.c.bf16 %v1958_v8, %v1956_v10 }
 0x4b3   : > { %v3273_v13 = vpop.eup %3272 }
 0x4b4   : > { %2144 = vmatprep.mubr.bf16.mxu0 %v1983_v42  ;;  %v1961_v46 = vmul.f32 %v3273_v13, %v4027_v40  ;;  %v1960_v23 = vmul.f32 %v3273_v13, %v4025_v39 }
 0x4b5   : > { %v1918_v44 = vpop.xlane.xlu0 %1917  ;;  %2145 = vmatmul.mubr.bf16.gmra.mxu0 %v1982_v9 }
 0x4b6   : > { %3276 = vrcp.f32 %v1918_v44 }
 0x4b7   : > { %v3275_v45 = vpop.eup %3274 }
 0x4b8   : > { %v1963_v22 = vmul.f32 %v3275_v45, %v4037_v6  ;;  %v1962_v16 = vmul.f32 %v3275_v45, %v4034_v5 }
 0x4b9   : > { %v1912_v32 = vpop.xlane.xlu0 %1911 }
 0x4ba   : > { %v1985_v15 = vpack.c.bf16 %v1963_v22, %v1961_v46  ;;  %v1984_v47 = vpack.c.bf16 %v1962_v16, %v1960_v23 }
 0x4bb   : > { %v1921_v28 = vpop.xlane.xlu1 %1920 }
 0x4bc   : > { %3278 = vrcp.f32 %v1921_v28  ;;  %2152 = vmatprep.mubr.bf16.mxu0 %v1985_v15 }
 0x4bd   : > { %2153 = vmatmul.mubr.bf16.gmra.mxu0 %v1984_v47  ;;  %3280 = vrcp.f32 %v1912_v32 }
 0x4bf   : > { %v1924_v48 = vpop.xlane.xlu0 %1923  ;;  %v1915_v49 = vpop.xlane.xlu1 %1914 }
 0x4c0   : > { %3282 = vrcp.f32 %v1915_v49 }
 0x4c1   : > { %3284 = vrcp.f32 %v1924_v48 }
 0x4c3   : > { %v1927_v40 = vpop.xlane.xlu1 %1926  ;;  %v3277_v6 = vpop.eup %3276 }
 0x4c4   : > { %3286 = vrcp.f32 %v1927_v40  ;;  %v1969_v39 = vmul.f32 %v3277_v6, %v4049_v11  ;;  %v1968_v53 = vmul.f32 %v3277_v6, %v4047_v31 }
 0x4c9   : > { %v3279_v50 = vpop.eup %3278 }
 0x4ca   : > { %v1971_v5 = vmul.f32 %v3279_v50, %v4061_v27  ;;  %v1970_v30 = vmul.f32 %v3279_v50, %v4057_v35  ;;  %v3281_v58 = vpop.eup %3280 }
 0x4cb   : > { %v1965_v26 = vmul.f32 %v3281_v58, %v4055_v34  ;;  %v1964_v51 = vmul.f32 %v3281_v58, %v4053_v17 }
 0x4cc   : > { %v1989_v18 = vpack.c.bf16 %v1971_v5, %v1969_v39  ;;  %v1988_v19 = vpack.c.bf16 %v1970_v30, %v1968_v53 }
 0x4cd   : > { %v3283_v25 = vpop.eup %3282 }
 0x4ce   : > { %2168 = vmatprep.mubr.bf16.mxu1 %v1989_v18  ;;  %v3285_v61 = vpop.eup %3284  ;;  %v1967_v0 = vmul.f32 %v3283_v25, %v4067_v33  ;;  %v1966_v11 = vmul.f32 %v3283_v25, %v4063_v59 }
 0x4cf   : > { %2169 = vmatmul.mubr.bf16.vlgmr.msra.gmra.mxu1 %v1988_v19  ;;  %v1973_v35 = vmul.f32 %v3285_v61, %v4073_v38  ;;  %v1972_v24 = vmul.f32 %v3285_v61, %v4069_v63 }
 0x4d0   : > { %v1987_v57 = vpack.c.bf16 %v1967_v0, %v1965_v26  ;;  %v1986_v31 = vpack.c.bf16 %v1966_v11, %v1964_v51 }
 0x4d1   : > { %v3287_v27 = vpop.eup %3286 }
 0x4d2   : > { %v1975_v62 = vmul.f32 %v3287_v27, %v4079_v43  ;;  %v1974_v52 = vmul.f32 %v3287_v27, %v4075_v41  ;;  %2160 = vmatprep.mubr.bf16.mxu0 %v1987_v57 }
 0x4d3   : > { %2161 = vmatmul.mubr.bf16.gmra.mxu0 %v1986_v31 }
 0x4d4   : > { %v1991_v34 = vpack.c.bf16 %v1975_v62, %v1973_v35  ;;  %v1990_v33 = vpack.c.bf16 %v1974_v52, %v1972_v24 }
 0x4d6   : > { %2176 = vmatprep.mubr.bf16.mxu1 %v1991_v34 }
 0x4d7   : > { %2177 = vmatmul.mubr.bf16.gmra.mxu1 %v1990_v33 }
 0x55d   : > { %v2799_v17 = vpop.f32.mrf.mxu0 }
 0x55f   : > { %v2800_v59 = vpop.f32.mrf.mxu0 }
 0x560   : > { %v2801_v12 = vadd.f32 %v2800_v59, %v2799_v17 }
 0x561   : > { %v2802_v36 = vpop.f32.mrf.mxu0 }
 0x563   : > { %v2803_v3 = vpop.f32.mrf.mxu0 }
 0x564   : > { %v2804_v38 = vadd.f32 %v2803_v3, %v2802_v36 }
 0x565   : > { %v2805_v54 = vpop.f32.mrf.mxu0 }
 0x566   : > { %v2643_v43 = vpack.c.bf16 %v2804_v38, %v2801_v12 }
 0x567   : > { %v2806_v55 = vpop.f32.mrf.mxu0 }
 0x568   : > { %2644 = vst [vmem:[%s3712_s10] sm:$0xff] %v2643_v43   ;;  %v2807_v20 = vadd.f32 %v2806_v55, %v2805_v54 }
 0x569   : > { %v2808_v63 = vpop.f32.mrf.mxu0 }
 0x56b   : > { %v2809_v41 = vpop.f32.mrf.mxu0 }
 0x56c   : > { %v2810_v2 = vadd.f32 %v2809_v41, %v2808_v63 }
 0x56d   : > { %v2811_v7 = vpop.f32.mrf.mxu0 }
 0x56e   : > { %v2648_v1 = vpack.c.bf16 %v2810_v2, %v2807_v20 }
 0x56f   : > { %v2812_v21 = vpop.f32.mrf.mxu0 }
 0x570   : > { %2680 = vst [vmem:[%s3712_s10 + $0x8] sm:$0xff] %v2648_v1   ;;  %v2813_v14 = vadd.f32 %v2812_v21, %v2811_v7 }
 0x571   : > { %v2814_v4 = vpop.f32.mrf.mxu0 }
 0x573   : > { %v2815_v29 = vpop.f32.mrf.mxu0 }
 0x574   : > { %v2816_v56 = vadd.f32 %v2815_v29, %v2814_v4 }
 0x575   : > { %v2817_v60 = vpop.f32.mrf.mxu0 }
 0x576   : > { %v2653_v37 = vpack.c.bf16 %v2816_v56, %v2813_v14 }
 0x577   : > { %v2818_v10 = vpop.f32.mrf.mxu0 }
 0x578   : > { %2681 = vst [vmem:[%s3712_s10 + $0x10] sm:$0xff] %v2653_v37   ;;  %v2819_v9 = vadd.f32 %v2818_v10, %v2817_v60 }
 0x579   : > { %v2820_v8 = vpop.f32.mrf.mxu0 }
 0x57b   : > { %v2821_v42 = vpop.f32.mrf.mxu0 }
 0x57c   : > { %v2822_v13 = vadd.f32 %v2821_v42, %v2820_v8 }
 0x57d   : > { %v2823_v44 = vpop.f32.mrf.mxu0 }
 0x57e   : > { %v2658_v45 = vpack.c.bf16 %v2822_v13, %v2819_v9 }
 0x57f   : > { %v2824_v46 = vpop.f32.mrf.mxu0 }
 0x580   : > { %2682 = vst [vmem:[%s3712_s10 + $0x18] sm:$0xff] %v2658_v45   ;;  %v2825_v16 = vadd.f32 %v2824_v46, %v2823_v44 }
 0x581   : > { %v2826_v22 = vpop.f32.mrf.mxu0 }
 0x583   : > { %v2827_v23 = vpop.f32.mrf.mxu0 }
 0x584   : > { %v2828_v32 = vadd.f32 %v2827_v23, %v2826_v22 }
 0x586   : > { %v2663_v15 = vpack.c.bf16 %v2828_v32, %v2825_v16 }
 0x588   : > { %2683 = vst [vmem:[%s3712_s10 + $0x20] sm:$0xff] %v2663_v15  }
 0x58f   : > { %v2835_v47 = vpop.f32.mrf.mxu1 }
 0x591   : > { %v2836_v28 = vpop.f32.mrf.mxu1 }
 0x592   : > { %v2837_v6 = vadd.f32 %v2836_v28, %v2835_v47 }
 0x593   : > { %v2838_v48 = vpop.f32.mrf.mxu1  ;;  %v2829_v49 = vpop.f32.mrf.mxu0 }
 0x595   : > { %v2839_v40 = vpop.f32.mrf.mxu1  ;;  %v2830_v50 = vpop.f32.mrf.mxu0 }
 0x596   : > { %v2840_v39 = vadd.f32 %v2839_v40, %v2838_v48  ;;  %v2831_v19 = vadd.f32 %v2830_v50, %v2829_v49 }
 0x597   : > { %v2841_v5 = vpop.f32.mrf.mxu1  ;;  %v2832_v30 = vpop.f32.mrf.mxu0 }
 0x598   : > { %v2673_v53 = vpack.c.bf16 %v2840_v39, %v2837_v6 }
 0x599   : > { %v2842_v58 = vpop.f32.mrf.mxu1  ;;  %v2833_v18 = vpop.f32.mrf.mxu0 }
 0x59a   : > { %2685 = vst [vmem:[%s3712_s10 + $0x30] sm:$0xff] %v2673_v53   ;;  %v2834_v25 = vadd.f32 %v2833_v18, %v2832_v30  ;;  %v2843_v51 = vadd.f32 %v2842_v58, %v2841_v5 }
 0x59b   : > { %v2844_v61 = vpop.f32.mrf.mxu1 }
 0x59c   : > { %v2668_v26 = vpack.c.bf16 %v2834_v25, %v2831_v19 }
 0x59d   : > { %v2845_v0 = vpop.f32.mrf.mxu1 }
 0x59e   : > { %v2846_v11 = vadd.f32 %v2845_v0, %v2844_v61  ;;  %2684 = vst [vmem:[%s3712_s10 + $0x28] sm:$0xff] %v2668_v26  }
 0x5a0   : > { %v2678_v27 = vpack.c.bf16 %v2846_v11, %v2843_v51 }
 0x5a2   : > { %2686 = vst [vmem:[%s3712_s10 + $0x38] sm:$0xff] %v2678_v27  }
 0x5a3   : > { %3381 = shalt.err (!%p3378_p1)
}
 0x5a4   : > { %s3382_s25 = scalar_lea.hbm %s4128_s9, 1024  ;;  %s3386_s3 = scalar_lea.hbm %s4238_s16, 4096 }
 0x5a5   : > { %p3383_p7 = scmp.ne.s32.totalorder %s4128_s9, %s3382_s25  ;;  %p3387_p0 = scmp.lt.s32.totalorder %s4128_s9, %s4238_s16 }
 0x5a6   : > { %p3388_p8 = scmp.lt.s32.totalorder %s3386_s3, %s3382_s25 }
 0x5a7   : > { %p3384_p9 = pnand %p3383_p7, %p4239_p10 }
 0x5a8   : > { %p3389_p11 = por %p3388_p8, %p3387_p0 }
 0x5a9   : > { %p3385_p13 = pneg %p3384_p9 }
 0x5ab   : > { %p3390_p3 = pnand %p3389_p11, %p3385_p13 }
 0x5ad   : > { %3393 = shalt.err (!%p3390_p3)
}
 0x5ae   : > { %s3502_s5 = smov 64   ;;  %s3503_s15 = smov 4  }
 0x5af   : > { %2905 = dma.vmem_to_hbm [thread:$0]  (%p4239_p10), %s4130_s14, 1024, %s4128_s9, %s4135_s6, %s3502_s5, %s3502_s5, %s3503_s15  }
 0x5b0 PF: > { %s4240_s24 = sld [smem:[#allocation13_spill]]  ;;  %p2927_p12 = scmp.ge.s32.totalorder %s3492_s28, 2 }
 0x5b1   : > { %s4241_s21 = sld [smem:[#allocation17_spill]] }
 0x5b6   : > { %s2296_s8 = sand.u32 1, %s4240_s24  }
 0x5b7   : > { %p4242_p2 = scmp.ne.s32.totalorder %s4241_s21, 0  ;;  %s2297_s11 = scalar_lea.sflag [#allocation5], %s2296_s8 }
 0x5b9   : > { %p2919_p4 = pnand %p2927_p12, %p4242_p2 }
 0x5bb   : > { %p2920_p6 = pneg %p2919_p4 }
 0x5bd   : > { %3447 = dma.done.wait (%p2920_p6), %s2297_s11, 1024  }
 0x5be   : > { %3449 = vsyncadd (%p2920_p6), %s2297_s11, 4294966272  ;;  %s22_s28 = sadd.s32 1, %s3492_s28   ;;  %s4243_s30 = smov %s3674_s18 }
 0x5bf   : > { %p19_p5 = scmp.ge.s32.totalorder %s22_s28, 6   ;;  %s4244_s24 = sld [smem:[#allocation15_spill]] }
 0x5c0   : > { %s4245_s14 = sld [smem:[#allocation18_spill]]  ;;  %s4246_s18 = smov %s3456_s19 }
 0x5c1   : > { %s4247_s19 = smov %s3460_s20  ;;  %s4248_s20 = smov %s3679_s26 }
 0x5c2   : > { %s4249_s21 = smov %s3468_s22  ;;  %s4250_s22 = smov %s3472_s23 }
 0x5c3   : > { %s4251_s23 = smov %s4243_s30  ;;  %s4252_s25 = smov %s3488_s27 }
 0x5c4   : > { %s4254_s27 = smov %s4260_s12  ;;  %21 = sbr.rel (!%p19_p5) target bundleno = 14 (0xe), region = 98 }
 0x5c6   : > { %s4253_s26 = smov %s4245_s14 }
 0x5c9   :  { %2302 = vsyncpa [#allocation4], 1 }
 0x5ca   :  { %2304 = vsyncpa [#allocation4 + $0x1], 1 }
 0x5cb   :  { %2305 = vsyncpa [#allocation7], 1 }
 0x5cc   :  { %2306 = vsyncpa [#allocation5], 1 }
 0x5cd   :  { %2308 = vsyncpa [#allocation5 + $0x1], 1 }

</bundles_post_ra>
